<compile_context>
chip_gen: v7x
topology: tpu7x:2x2x1
jax: 0.10.0
libtpu: 0.0.40
codegen_flags: <defaults>
</compile_context>

<pallas_src>
import functools

import jax
import jax.numpy as jnp
from jax import lax
from jax.experimental import pallas as pl
from jax.experimental.pallas import tpu as pltpu


def _lstm_step(gates, c_prev, h_dim):
    """PyTorch LSTMCell update from pre-activation gates (B, 4H), order [i,f,g,o].

    sigmoid/tanh are evaluated over the full (B, 4H) tile and sliced afterwards
    (cheaper than four narrow-lane EUP passes at h_dim=32).
    """
    sig = jax.nn.sigmoid(gates)
    tnh = jnp.tanh(gates)
    i = sig[:, 0 * h_dim:1 * h_dim]
    f = sig[:, 1 * h_dim:2 * h_dim]
    g = tnh[:, 2 * h_dim:3 * h_dim]
    o = sig[:, 3 * h_dim:4 * h_dim]
    c = f * c_prev + i * g
    h = o * jnp.tanh(c)
    return h, c


def draw3_kernel(x_ref, eps_ref,
                 w_enc_xsum_ref, w_enc_xhat_ref, w_enc_rec_ref, b_enc_ref,
                 w_dec_rec_ref, b_dec_ref,
                 w_var_ref, b_var_ref,
                 w_write_ref, b_write_ref,
                 w_obs_ref, b_obs_ref,
                 x_mu_ref, kl_ref,
                 *, h_dim, z_dim, T):
    B, x_dim = x_ref.shape

    x = x_ref[...]
    w_enc_xhat = w_enc_xhat_ref[...]
    w_enc_rec = w_enc_rec_ref[...]
    w_dec_rec = w_dec_rec_ref[...]
    b_dec = b_dec_ref[...]
    w_var = w_var_ref[...]
    b_var = b_var_ref[...]
    w_write = w_write_ref[...]
    b_write = b_write_ref[...]

    # Loop-invariant encoder contribution, computed once:
    #   x @ W_x + x_hat @ W_xhat == x @ (W_x + W_xhat) - sigmoid(canvas) @ W_xhat
    gates_e_const = (jnp.dot(x, w_enc_xsum_ref[...],
                             preferred_element_type=jnp.float32)
                     + b_enc_ref[...])

    zeros_h = jnp.zeros((B, h_dim), jnp.float32)
    carry0 = (zeros_h, zeros_h, zeros_h, zeros_h,
              jnp.zeros((B, x_dim), jnp.float32),   # canvas
              jnp.zeros((B, z_dim), jnp.float32))   # kl accumulator

    def step(t, carry):
        h_enc, c_enc, h_dec, c_dec, canvas, kl = carry

        # read (BaseAttention): r_t = [x, x - sigmoid(canvas)]; x-part hoisted.
        # Encoder LSTMCell with fused recurrent weights [W_hdec; W_hh].
        gates_e = (gates_e_const
                   - jnp.dot(jax.nn.sigmoid(canvas), w_enc_xhat,
                             preferred_element_type=jnp.float32)
                   + jnp.dot(jnp.concatenate([h_dec, h_enc], axis=1), w_enc_rec,
                             preferred_element_type=jnp.float32))
        h_enc, c_enc = _lstm_step(gates_e, c_enc, h_dim)

        # Variational posterior Q_t = Normal(q_mu, exp(q_log_std)); rsample.
        var = jnp.dot(h_enc, w_var, preferred_element_type=jnp.float32) + b_var
        q_mu = var[:, :z_dim]
        q_log_std = var[:, z_dim:]
        q_std = jnp.exp(q_log_std)
        z_t = q_mu + q_std * eps_ref[t]

        # Decoder LSTMCell with fused input/recurrent weights [W_ih; W_hh].
        gates_d = (jnp.dot(jnp.concatenate([z_t, h_dec], axis=1), w_dec_rec,
                           preferred_element_type=jnp.float32)
                   + b_dec)
        h_dec, c_dec = _lstm_step(gates_d, c_dec, h_dim)

        # write (BaseAttention): canvas is overwritten (not accumulated).
        canvas = (jnp.dot(h_dec, w_write, preferred_element_type=jnp.float32)
                  + b_write)

        # KL(Q_t || N(0,1)), elementwise over (B, z_dim), accumulated over T.
        kl = kl + (-q_log_std + 0.5 * (q_std * q_std + q_mu * q_mu) - 0.5)
        return (h_enc, c_enc, h_dec, c_dec, canvas, kl)

    _, _, _, _, canvas, kl = lax.fori_loop(0, T, step, carry0, unroll=True)

    # observation head
    x_mu_ref[...] = (jnp.dot(canvas, w_obs_ref[...],
                             preferred_element_type=jnp.float32)
                     + b_obs_ref[...])

    # lane-dense KL writeback: pad z_dim lanes up to the output slab width.
    pad = kl_ref.shape[1] - z_dim
    if pad > 0:
        kl_ref[...] = jnp.concatenate(
            [kl, jnp.zeros((B, pad), jnp.float32)], axis=1)
    else:
        kl_ref[...] = kl


@functools.partial(jax.jit, static_argnames=('h_dim', 'z_dim', 'T'))
def draw3_forward(x, eps, params, *, h_dim, z_dim, T):
    B, x_dim = x.shape
    assert eps.shape == (T, B, z_dim)

    # One-time parameter prep (outside the recurrence):
    #  - fold the loop-invariant x read term: W_x + W_xhat
    #  - stack small-K recurrent weights so each step issues fewer MXU ops
    prepped = [
        params['w_enc_x'] + params['w_enc_xhat'],                          # w_enc_xsum
        params['w_enc_xhat'],                                              # w_enc_xhat
        jnp.concatenate([params['w_enc_hdec'], params['w_enc_hh']], 0),    # (2h, 4h)
        params['b_enc'],
        jnp.concatenate([params['w_dec_ih'], params['w_dec_hh']], 0),      # (z+h, 4h)
        params['b_dec'],
        params['w_var'], params['b_var'],
        params['w_write'], params['b_write'],
        params['w_obs'], params['b_obs'],
    ]

    kl_width = max(128, ((z_dim + 127) // 128) * 128)   # lane-dense output slab

    kernel = functools.partial(draw3_kernel, h_dim=h_dim, z_dim=z_dim, T=T)
    vmem_spec = pl.BlockSpec(memory_space=pltpu.MemorySpace.VMEM)

    x_mu, kl_padded = pl.pallas_call(
        kernel,
        out_shape=(jax.ShapeDtypeStruct((B, x_dim), jnp.float32),
                   jax.ShapeDtypeStruct((B, kl_width), jnp.float32)),
        in_specs=[vmem_spec] * (2 + len(prepped)),
        out_specs=(vmem_spec, vmem_spec),
    )(x, eps, *prepped)

    return x_mu, kl_padded[:, :z_dim]


def draw3_reference(x, eps, p, *, h_dim, z_dim, T):
    """Pure-JAX reference replicating the PyTorch forward pass (unfused form)."""
    B, x_dim = x.shape
    h_enc = jnp.zeros((B, h_dim)); c_enc = jnp.zeros((B, h_dim))
    h_dec = jnp.zeros((B, h_dim)); c_dec = jnp.zeros((B, h_dim))
    canvas = jnp.zeros((B, x_dim))
    kl = jnp.zeros((B, z_dim))
    for t in range(T):
        x_hat = x - jax.nn.sigmoid(canvas)
        gates_e = (x @ p['w_enc_x'] + x_hat @ p['w_enc_xhat']
                   + h_dec @ p['w_enc_hdec'] + h_enc @ p['w_enc_hh'] + p['b_enc'])
        h_enc, c_enc = _lstm_step(gates_e, c_enc, h_dim)
        var = h_enc @ p['w_var'] + p['b_var']
        q_mu, q_log_std = var[:, :z_dim], var[:, z_dim:]
        q_std = jnp.exp(q_log_std)
        z_t = q_mu + q_std * eps[t]
        gates_d = z_t @ p['w_dec_ih'] + h_dec @ p['w_dec_hh'] + p['b_dec']
        h_dec, c_dec = _lstm_step(gates_d, c_dec, h_dim)
        canvas = h_dec @ p['w_write'] + p['b_write']
        kl = kl + (-q_log_std + 0.5 * (q_std * q_std + q_mu * q_mu) - 0.5)
    x_mu = canvas @ p['w_obs'] + p['b_obs']
    return x_mu, kl


def make_params(key, *, x_dim, h_dim, z_dim):
    """Deterministic synthetic parameters (shapes match the PyTorch module)."""
    keys = jax.random.split(key, 14)
    s = 0.1
    return {
        # encoder LSTMCell: weight_ih is (4H, enc_dim) in torch with
        # enc_dim = 2*x_dim + h_dim; stored transposed and split by input block.
        'w_enc_x':    s * jax.random.normal(keys[0],  (x_dim, 4 * h_dim), jnp.float32),
        'w_enc_xhat': s * jax.random.normal(keys[1],  (x_dim, 4 * h_dim), jnp.float32),
        'w_enc_hdec': s * jax.random.normal(keys[2],  (h_dim, 4 * h_dim), jnp.float32),
        'w_enc_hh':   s * jax.random.normal(keys[3],  (h_dim, 4 * h_dim), jnp.float32),
        'b_enc':      s * jax.random.normal(keys[4],  (1, 4 * h_dim), jnp.float32),
        # decoder LSTMCell (input = z_dim)
        'w_dec_ih':   s * jax.random.normal(keys[5],  (z_dim, 4 * h_dim), jnp.float32),
        'w_dec_hh':   s * jax.random.normal(keys[6],  (h_dim, 4 * h_dim), jnp.float32),
        'b_dec':      s * jax.random.normal(keys[7],  (1, 4 * h_dim), jnp.float32),
        # variational head: Linear(h_dim, 2*z_dim)
        'w_var':      s * jax.random.normal(keys[8],  (h_dim, 2 * z_dim), jnp.float32),
        'b_var':      s * jax.random.normal(keys[9],  (1, 2 * z_dim), jnp.float32),
        # attention write head: Linear(h_dim, x_dim)
        'w_write':    s * jax.random.normal(keys[10], (h_dim, x_dim), jnp.float32),
        'b_write':    s * jax.random.normal(keys[11], (1, x_dim), jnp.float32),
        # observation head: Linear(x_dim, x_dim)
        'w_obs':      s * jax.random.normal(keys[12], (x_dim, x_dim), jnp.float32),
        'b_obs':      s * jax.random.normal(keys[13], (1, x_dim), jnp.float32),
    }


if __name__ == "__main__":
    # config: attention='base', h_dim=32, z_dim=16, T=4, x_shape=(8, 16)
    B = 8
    x_shape = (8, 16)
    x_dim = x_shape[0] * x_shape[1]   # 128
    h_dim = 32
    z_dim = 16
    T = 4

    key = jax.random.PRNGKey(0)
    k_x, k_eps, k_p = jax.random.split(key, 3)
    x = jax.random.uniform(k_x, (B, x_dim), jnp.float32)          # flattened image
    eps = jax.random.normal(k_eps, (T, B, z_dim), jnp.float32)    # reparameterization noise
    params = make_params(k_p, x_dim=x_dim, h_dim=h_dim, z_dim=z_dim)

    x_mu, kl = draw3_forward(x, eps, params, h_dim=h_dim, z_dim=z_dim, T=T)
    jax.block_until_ready((x_mu, kl))

    x_mu_ref, kl_ref = draw3_reference(x, eps, params, h_dim=h_dim, z_dim=z_dim, T=T)
    assert jnp.allclose(x_mu, x_mu_ref, rtol=2e-3, atol=2e-3), "x_mu mismatch"
    assert jnp.allclose(kl, kl_ref, rtol=2e-3, atol=2e-3), "kl mismatch"

    print("KERNEL_OK")
</pallas_src>

<mosaic_0001>
module attributes {stable_mosaic.version = 11 : i64} {
  func.func @draw3_kernel(%arg0: memref<8x128xf32, #tpu.memory_space<vmem>>, %arg1: memref<4x8x16xf32, #tpu.memory_space<vmem>>, %arg2: memref<128x128xf32, #tpu.memory_space<vmem>>, %arg3: memref<128x128xf32, #tpu.memory_space<vmem>>, %arg4: memref<64x128xf32, #tpu.memory_space<vmem>>, %arg5: memref<1x128xf32, #tpu.memory_space<vmem>>, %arg6: memref<48x128xf32, #tpu.memory_space<vmem>>, %arg7: memref<1x128xf32, #tpu.memory_space<vmem>>, %arg8: memref<32x32xf32, #tpu.memory_space<vmem>>, %arg9: memref<1x32xf32, #tpu.memory_space<vmem>>, %arg10: memref<32x128xf32, #tpu.memory_space<vmem>>, %arg11: memref<1x128xf32, #tpu.memory_space<vmem>>, %arg12: memref<128x128xf32, #tpu.memory_space<vmem>>, %arg13: memref<1x128xf32, #tpu.memory_space<vmem>>, %arg14: memref<8x128xf32, #tpu.memory_space<vmem>>, %arg15: memref<8x128xf32, #tpu.memory_space<vmem>>) attributes {dimension_semantics = [], scalar_prefetch = 0 : i64, scratch_operands = 0 : i64, tpu.core_type = #tpu.core_type<tc>} {
    %c0 = arith.constant 0 : index
    %c0_0 = arith.constant 0 : index
    %0 = vector.load %arg0[%c0, %c0_0] : memref<8x128xf32, #tpu.memory_space<vmem>>, vector<8x128xf32>
    %c0_1 = arith.constant 0 : index
    %c0_2 = arith.constant 0 : index
    %1 = vector.load %arg3[%c0_1, %c0_2] : memref<128x128xf32, #tpu.memory_space<vmem>>, vector<128x128xf32>
    %c0_3 = arith.constant 0 : index
    %c0_4 = arith.constant 0 : index
    %2 = vector.load %arg4[%c0_3, %c0_4] : memref<64x128xf32, #tpu.memory_space<vmem>>, vector<64x128xf32>
    %c0_5 = arith.constant 0 : index
    %c0_6 = arith.constant 0 : index
    %3 = vector.load %arg6[%c0_5, %c0_6] : memref<48x128xf32, #tpu.memory_space<vmem>>, vector<48x128xf32>
    %c0_7 = arith.constant 0 : index
    %c0_8 = arith.constant 0 : index
    %4 = vector.load %arg7[%c0_7, %c0_8] : memref<1x128xf32, #tpu.memory_space<vmem>>, vector<1x128xf32>
    %c0_9 = arith.constant 0 : index
    %c0_10 = arith.constant 0 : index
    %5 = vector.load %arg8[%c0_9, %c0_10] : memref<32x32xf32, #tpu.memory_space<vmem>>, vector<32x32xf32>
    %c0_11 = arith.constant 0 : index
    %c0_12 = arith.constant 0 : index
    %6 = vector.load %arg9[%c0_11, %c0_12] : memref<1x32xf32, #tpu.memory_space<vmem>>, vector<1x32xf32>
    %c0_13 = arith.constant 0 : index
    %c0_14 = arith.constant 0 : index
    %7 = vector.load %arg10[%c0_13, %c0_14] : memref<32x128xf32, #tpu.memory_space<vmem>>, vector<32x128xf32>
    %c0_15 = arith.constant 0 : index
    %c0_16 = arith.constant 0 : index
    %8 = vector.load %arg11[%c0_15, %c0_16] : memref<1x128xf32, #tpu.memory_space<vmem>>, vector<1x128xf32>
    %c0_17 = arith.constant 0 : index
    %c0_18 = arith.constant 0 : index
    %9 = vector.load %arg2[%c0_17, %c0_18] : memref<128x128xf32, #tpu.memory_space<vmem>>, vector<128x128xf32>
    %cst = arith.constant dense<0.000000e+00> : vector<8x128xf32>
    %10 = tpu.matmul %0, %9, %cst {dimension_numbers = #tpu.dot_dimension_numbers<[1], [0], [0], [1], [0, 0, 1, 1], [], []>} : vector<8x128xf32>, vector<128x128xf32>, vector<8x128xf32> -> vector<8x128xf32>
    %c0_19 = arith.constant 0 : index
    %c0_20 = arith.constant 0 : index
    %11 = vector.load %arg5[%c0_19, %c0_20] : memref<1x128xf32, #tpu.memory_space<vmem>>, vector<1x128xf32>
    %12 = vector.broadcast %11 : vector<1x128xf32> to vector<8x128xf32>
    %13 = arith.addf %10, %12 : vector<8x128xf32>
    %cst_21 = arith.constant 0.000000e+00 : f32
    %14 = vector.broadcast %cst_21 : f32 to vector<8x32xf32>
    %cst_22 = arith.constant 0.000000e+00 : f32
    %15 = vector.broadcast %cst_22 : f32 to vector<8x128xf32>
    %cst_23 = arith.constant 0.000000e+00 : f32
    %16 = vector.broadcast %cst_23 : f32 to vector<8x16xf32>
    %c0_i32 = arith.constant 0 : i32
    %17 = arith.negf %15 : vector<8x128xf32>
    %18 = math.exp %17 : vector<8x128xf32>
    %cst_24 = arith.constant 1.000000e+00 : f32
    %19 = vector.broadcast %cst_24 : f32 to vector<8x128xf32>
    %20 = arith.addf %19, %18 : vector<8x128xf32>
    %21 = arith.divf %19, %20 : vector<8x128xf32>
    %cst_25 = arith.constant dense<0.000000e+00> : vector<8x128xf32>
    %22 = tpu.matmul %21, %1, %cst_25 {dimension_numbers = #tpu.dot_dimension_numbers<[1], [0], [0], [1], [0, 0, 1, 1], [], []>} : vector<8x128xf32>, vector<128x128xf32>, vector<8x128xf32> -> vector<8x128xf32>
    %23 = arith.subf %13, %22 : vector<8x128xf32>
    %24 = tpu.concatenate %14, %14 in 1 : vector<8x32xf32>, vector<8x32xf32> -> vector<8x64xf32>
    %cst_26 = arith.constant dense<0.000000e+00> : vector<8x128xf32>
    %25 = tpu.matmul %24, %2, %cst_26 {dimension_numbers = #tpu.dot_dimension_numbers<[1], [0], [0], [1], [0, 0, 1, 1], [], []>} : vector<8x64xf32>, vector<64x128xf32>, vector<8x128xf32> -> vector<8x128xf32>
    %26 = arith.addf %23, %25 : vector<8x128xf32>
    %27 = arith.negf %26 : vector<8x128xf32>
    %28 = math.exp %27 : vector<8x128xf32>
    %cst_27 = arith.constant 1.000000e+00 : f32
    %29 = vector.broadcast %cst_27 : f32 to vector<8x128xf32>
    %30 = arith.addf %29, %28 : vector<8x128xf32>
    %31 = arith.divf %29, %30 : vector<8x128xf32>
    %32 = math.tanh %26 : vector<8x128xf32>
    %33 = vector.extract_strided_slice %31 {offsets = [0, 0], sizes = [8, 32], strides = [1, 1]} : vector<8x128xf32> to vector<8x32xf32>
    %34 = vector.extract_strided_slice %31 {offsets = [0, 32], sizes = [8, 32], strides = [1, 1]} : vector<8x128xf32> to vector<8x32xf32>
    %35 = vector.extract_strided_slice %32 {offsets = [0, 64], sizes = [8, 32], strides = [1, 1]} : vector<8x128xf32> to vector<8x32xf32>
    %36 = vector.extract_strided_slice %31 {offsets = [0, 96], sizes = [8, 32], strides = [1, 1]} : vector<8x128xf32> to vector<8x32xf32>
    %37 = arith.mulf %34, %14 : vector<8x32xf32>
    %38 = arith.mulf %33, %35 : vector<8x32xf32>
    %39 = arith.addf %37, %38 : vector<8x32xf32>
    %40 = math.tanh %39 : vector<8x32xf32>
    %41 = arith.mulf %36, %40 : vector<8x32xf32>
    %cst_28 = arith.constant dense<0.000000e+00> : vector<8x32xf32>
    %42 = tpu.matmul %41, %5, %cst_28 {dimension_numbers = #tpu.dot_dimension_numbers<[1], [0], [0], [1], [0, 0, 1, 1], [], []>} : vector<8x32xf32>, vector<32x32xf32>, vector<8x32xf32> -> vector<8x32xf32>
    %43 = vector.broadcast %6 : vector<1x32xf32> to vector<8x32xf32>
    %44 = arith.addf %42, %43 : vector<8x32xf32>
    %45 = vector.extract_strided_slice %44 {offsets = [0, 0], sizes = [8, 16], strides = [1, 1]} : vector<8x32xf32> to vector<8x16xf32>
    %46 = vector.extract_strided_slice %44 {offsets = [0, 16], sizes = [8, 16], strides = [1, 1]} : vector<8x32xf32> to vector<8x16xf32>
    %47 = math.exp %46 : vector<8x16xf32>
    %48 = arith.index_cast %c0_i32 : i32 to index
    %c0_29 = arith.constant 0 : index
    %c0_30 = arith.constant 0 : index
    %49 = vector.load %arg1[%48, %c0_29, %c0_30] : memref<4x8x16xf32, #tpu.memory_space<vmem>>, vector<1x8x16xf32>
    %50 = vector.shape_cast %49 : vector<1x8x16xf32> to vector<8x16xf32>
    %51 = arith.mulf %47, %50 : vector<8x16xf32>
    %52 = arith.addf %45, %51 : vector<8x16xf32>
    %53 = tpu.concatenate %52, %14 in 1 : vector<8x16xf32>, vector<8x32xf32> -> vector<8x48xf32>
    %cst_31 = arith.constant dense<0.000000e+00> : vector<8x128xf32>
    %54 = tpu.matmul %53, %3, %cst_31 {dimension_numbers = #tpu.dot_dimension_numbers<[1], [0], [0], [1], [0, 0, 1, 1], [], []>} : vector<8x48xf32>, vector<48x128xf32>, vector<8x128xf32> -> vector<8x128xf32>
    %55 = vector.broadcast %4 : vector<1x128xf32> to vector<8x128xf32>
    %56 = arith.addf %54, %55 : vector<8x128xf32>
    %57 = arith.negf %56 : vector<8x128xf32>
    %58 = math.exp %57 : vector<8x128xf32>
    %cst_32 = arith.constant 1.000000e+00 : f32
    %59 = vector.broadcast %cst_32 : f32 to vector<8x128xf32>
    %60 = arith.addf %59, %58 : vector<8x128xf32>
    %61 = arith.divf %59, %60 : vector<8x128xf32>
    %62 = math.tanh %56 : vector<8x128xf32>
    %63 = vector.extract_strided_slice %61 {offsets = [0, 0], sizes = [8, 32], strides = [1, 1]} : vector<8x128xf32> to vector<8x32xf32>
    %64 = vector.extract_strided_slice %61 {offsets = [0, 32], sizes = [8, 32], strides = [1, 1]} : vector<8x128xf32> to vector<8x32xf32>
    %65 = vector.extract_strided_slice %62 {offsets = [0, 64], sizes = [8, 32], strides = [1, 1]} : vector<8x128xf32> to vector<8x32xf32>
    %66 = vector.extract_strided_slice %61 {offsets = [0, 96], sizes = [8, 32], strides = [1, 1]} : vector<8x128xf32> to vector<8x32xf32>
    %67 = arith.mulf %64, %14 : vector<8x32xf32>
    %68 = arith.mulf %63, %65 : vector<8x32xf32>
    %69 = arith.addf %67, %68 : vector<8x32xf32>
    %70 = math.tanh %69 : vector<8x32xf32>
    %71 = arith.mulf %66, %70 : vector<8x32xf32>
    %cst_33 = arith.constant dense<0.000000e+00> : vector<8x128xf32>
    %72 = tpu.matmul %71, %7, %cst_33 {dimension_numbers = #tpu.dot_dimension_numbers<[1], [0], [0], [1], [0, 0, 1, 1], [], []>} : vector<8x32xf32>, vector<32x128xf32>, vector<8x128xf32> -> vector<8x128xf32>
    %73 = vector.broadcast %8 : vector<1x128xf32> to vector<8x128xf32>
    %74 = arith.addf %72, %73 : vector<8x128xf32>
    %cst_34 = arith.constant 0.000000e+00 : f32
    %75 = vector.broadcast %cst_34 : f32 to vector<8x16xf32>
    %76 = arith.subf %75, %46 : vector<8x16xf32>
    %77 = arith.mulf %47, %47 : vector<8x16xf32>
    %78 = arith.mulf %45, %45 : vector<8x16xf32>
    %79 = arith.addf %77, %78 : vector<8x16xf32>
    %cst_35 = arith.constant 5.000000e-01 : f32
    %80 = vector.broadcast %cst_35 : f32 to vector<8x16xf32>
    %81 = arith.mulf %80, %79 : vector<8x16xf32>
    %82 = arith.addf %76, %81 : vector<8x16xf32>
    %cst_36 = arith.constant 5.000000e-01 : f32
    %83 = vector.broadcast %cst_36 : f32 to vector<8x16xf32>
    %84 = arith.subf %82, %83 : vector<8x16xf32>
    %85 = arith.addf %16, %84 : vector<8x16xf32>
    %c1_i32 = arith.constant 1 : i32
    %86 = arith.negf %74 : vector<8x128xf32>
    %87 = math.exp %86 : vector<8x128xf32>
    %cst_37 = arith.constant 1.000000e+00 : f32
    %88 = vector.broadcast %cst_37 : f32 to vector<8x128xf32>
    %89 = arith.addf %88, %87 : vector<8x128xf32>
    %90 = arith.divf %88, %89 : vector<8x128xf32>
    %cst_38 = arith.constant dense<0.000000e+00> : vector<8x128xf32>
    %91 = tpu.matmul %90, %1, %cst_38 {dimension_numbers = #tpu.dot_dimension_numbers<[1], [0], [0], [1], [0, 0, 1, 1], [], []>} : vector<8x128xf32>, vector<128x128xf32>, vector<8x128xf32> -> vector<8x128xf32>
    %92 = arith.subf %13, %91 : vector<8x128xf32>
    %93 = tpu.concatenate %71, %41 in 1 : vector<8x32xf32>, vector<8x32xf32> -> vector<8x64xf32>
    %cst_39 = arith.constant dense<0.000000e+00> : vector<8x128xf32>
    %94 = tpu.matmul %93, %2, %cst_39 {dimension_numbers = #tpu.dot_dimension_numbers<[1], [0], [0], [1], [0, 0, 1, 1], [], []>} : vector<8x64xf32>, vector<64x128xf32>, vector<8x128xf32> -> vector<8x128xf32>
    %95 = arith.addf %92, %94 : vector<8x128xf32>
    %96 = arith.negf %95 : vector<8x128xf32>
    %97 = math.exp %96 : vector<8x128xf32>
    %cst_40 = arith.constant 1.000000e+00 : f32
    %98 = vector.broadcast %cst_40 : f32 to vector<8x128xf32>
    %99 = arith.addf %98, %97 : vector<8x128xf32>
    %100 = arith.divf %98, %99 : vector<8x128xf32>
    %101 = math.tanh %95 : vector<8x128xf32>
    %102 = vector.extract_strided_slice %100 {offsets = [0, 0], sizes = [8, 32], strides = [1, 1]} : vector<8x128xf32> to vector<8x32xf32>
    %103 = vector.extract_strided_slice %100 {offsets = [0, 32], sizes = [8, 32], strides = [1, 1]} : vector<8x128xf32> to vector<8x32xf32>
    %104 = vector.extract_strided_slice %101 {offsets = [0, 64], sizes = [8, 32], strides = [1, 1]} : vector<8x128xf32> to vector<8x32xf32>
    %105 = vector.extract_strided_slice %100 {offsets = [0, 96], sizes = [8, 32], strides = [1, 1]} : vector<8x128xf32> to vector<8x32xf32>
    %106 = arith.mulf %103, %39 : vector<8x32xf32>
    %107 = arith.mulf %102, %104 : vector<8x32xf32>
    %108 = arith.addf %106, %107 : vector<8x32xf32>
    %109 = math.tanh %108 : vector<8x32xf32>
    %110 = arith.mulf %105, %109 : vector<8x32xf32>
    %cst_41 = arith.constant dense<0.000000e+00> : vector<8x32xf32>
    %111 = tpu.matmul %110, %5, %cst_41 {dimension_numbers = #tpu.dot_dimension_numbers<[1], [0], [0], [1], [0, 0, 1, 1], [], []>} : vector<8x32xf32>, vector<32x32xf32>, vector<8x32xf32> -> vector<8x32xf32>
    %112 = vector.broadcast %6 : vector<1x32xf32> to vector<8x32xf32>
    %113 = arith.addf %111, %112 : vector<8x32xf32>
    %114 = vector.extract_strided_slice %113 {offsets = [0, 0], sizes = [8, 16], strides = [1, 1]} : vector<8x32xf32> to vector<8x16xf32>
    %115 = vector.extract_strided_slice %113 {offsets = [0, 16], sizes = [8, 16], strides = [1, 1]} : vector<8x32xf32> to vector<8x16xf32>
    %116 = math.exp %115 : vector<8x16xf32>
    %117 = arith.index_cast %c1_i32 : i32 to index
    %c0_42 = arith.constant 0 : index
    %c0_43 = arith.constant 0 : index
    %118 = vector.load %arg1[%117, %c0_42, %c0_43] : memref<4x8x16xf32, #tpu.memory_space<vmem>>, vector<1x8x16xf32>
    %119 = vector.shape_cast %118 : vector<1x8x16xf32> to vector<8x16xf32>
    %120 = arith.mulf %116, %119 : vector<8x16xf32>
    %121 = arith.addf %114, %120 : vector<8x16xf32>
    %122 = tpu.concatenate %121, %71 in 1 : vector<8x16xf32>, vector<8x32xf32> -> vector<8x48xf32>
    %cst_44 = arith.constant dense<0.000000e+00> : vector<8x128xf32>
    %123 = tpu.matmul %122, %3, %cst_44 {dimension_numbers = #tpu.dot_dimension_numbers<[1], [0], [0], [1], [0, 0, 1, 1], [], []>} : vector<8x48xf32>, vector<48x128xf32>, vector<8x128xf32> -> vector<8x128xf32>
    %124 = vector.broadcast %4 : vector<1x128xf32> to vector<8x128xf32>
    %125 = arith.addf %123, %124 : vector<8x128xf32>
    %126 = arith.negf %125 : vector<8x128xf32>
    %127 = math.exp %126 : vector<8x128xf32>
    %cst_45 = arith.constant 1.000000e+00 : f32
    %128 = vector.broadcast %cst_45 : f32 to vector<8x128xf32>
    %129 = arith.addf %128, %127 : vector<8x128xf32>
    %130 = arith.divf %128, %129 : vector<8x128xf32>
    %131 = math.tanh %125 : vector<8x128xf32>
    %132 = vector.extract_strided_slice %130 {offsets = [0, 0], sizes = [8, 32], strides = [1, 1]} : vector<8x128xf32> to vector<8x32xf32>
    %133 = vector.extract_strided_slice %130 {offsets = [0, 32], sizes = [8, 32], strides = [1, 1]} : vector<8x128xf32> to vector<8x32xf32>
    %134 = vector.extract_strided_slice %131 {offsets = [0, 64], sizes = [8, 32], strides = [1, 1]} : vector<8x128xf32> to vector<8x32xf32>
    %135 = vector.extract_strided_slice %130 {offsets = [0, 96], sizes = [8, 32], strides = [1, 1]} : vector<8x128xf32> to vector<8x32xf32>
    %136 = arith.mulf %133, %69 : vector<8x32xf32>
    %137 = arith.mulf %132, %134 : vector<8x32xf32>
    %138 = arith.addf %136, %137 : vector<8x32xf32>
    %139 = math.tanh %138 : vector<8x32xf32>
    %140 = arith.mulf %135, %139 : vector<8x32xf32>
    %cst_46 = arith.constant dense<0.000000e+00> : vector<8x128xf32>
    %141 = tpu.matmul %140, %7, %cst_46 {dimension_numbers = #tpu.dot_dimension_numbers<[1], [0], [0], [1], [0, 0, 1, 1], [], []>} : vector<8x32xf32>, vector<32x128xf32>, vector<8x128xf32> -> vector<8x128xf32>
    %142 = vector.broadcast %8 : vector<1x128xf32> to vector<8x128xf32>
    %143 = arith.addf %141, %142 : vector<8x128xf32>
    %cst_47 = arith.constant 0.000000e+00 : f32
    %144 = vector.broadcast %cst_47 : f32 to vector<8x16xf32>
    %145 = arith.subf %144, %115 : vector<8x16xf32>
    %146 = arith.mulf %116, %116 : vector<8x16xf32>
    %147 = arith.mulf %114, %114 : vector<8x16xf32>
    %148 = arith.addf %146, %147 : vector<8x16xf32>
    %cst_48 = arith.constant 5.000000e-01 : f32
    %149 = vector.broadcast %cst_48 : f32 to vector<8x16xf32>
    %150 = arith.mulf %149, %148 : vector<8x16xf32>
    %151 = arith.addf %145, %150 : vector<8x16xf32>
    %cst_49 = arith.constant 5.000000e-01 : f32
    %152 = vector.broadcast %cst_49 : f32 to vector<8x16xf32>
    %153 = arith.subf %151, %152 : vector<8x16xf32>
    %154 = arith.addf %85, %153 : vector<8x16xf32>
    %c2_i32 = arith.constant 2 : i32
    %155 = arith.negf %143 : vector<8x128xf32>
    %156 = math.exp %155 : vector<8x128xf32>
    %cst_50 = arith.constant 1.000000e+00 : f32
    %157 = vector.broadcast %cst_50 : f32 to vector<8x128xf32>
    %158 = arith.addf %157, %156 : vector<8x128xf32>
    %159 = arith.divf %157, %158 : vector<8x128xf32>
    %cst_51 = arith.constant dense<0.000000e+00> : vector<8x128xf32>
    %160 = tpu.matmul %159, %1, %cst_51 {dimension_numbers = #tpu.dot_dimension_numbers<[1], [0], [0], [1], [0, 0, 1, 1], [], []>} : vector<8x128xf32>, vector<128x128xf32>, vector<8x128xf32> -> vector<8x128xf32>
    %161 = arith.subf %13, %160 : vector<8x128xf32>
    %162 = tpu.concatenate %140, %110 in 1 : vector<8x32xf32>, vector<8x32xf32> -> vector<8x64xf32>
    %cst_52 = arith.constant dense<0.000000e+00> : vector<8x128xf32>
    %163 = tpu.matmul %162, %2, %cst_52 {dimension_numbers = #tpu.dot_dimension_numbers<[1], [0], [0], [1], [0, 0, 1, 1], [], []>} : vector<8x64xf32>, vector<64x128xf32>, vector<8x128xf32> -> vector<8x128xf32>
    %164 = arith.addf %161, %163 : vector<8x128xf32>
    %165 = arith.negf %164 : vector<8x128xf32>
    %166 = math.exp %165 : vector<8x128xf32>
    %cst_53 = arith.constant 1.000000e+00 : f32
    %167 = vector.broadcast %cst_53 : f32 to vector<8x128xf32>
    %168 = arith.addf %167, %166 : vector<8x128xf32>
    %169 = arith.divf %167, %168 : vector<8x128xf32>
    %170 = math.tanh %164 : vector<8x128xf32>
    %171 = vector.extract_strided_slice %169 {offsets = [0, 0], sizes = [8, 32], strides = [1, 1]} : vector<8x128xf32> to vector<8x32xf32>
    %172 = vector.extract_strided_slice %169 {offsets = [0, 32], sizes = [8, 32], strides = [1, 1]} : vector<8x128xf32> to vector<8x32xf32>
    %173 = vector.extract_strided_slice %170 {offsets = [0, 64], sizes = [8, 32], strides = [1, 1]} : vector<8x128xf32> to vector<8x32xf32>
    %174 = vector.extract_strided_slice %169 {offsets = [0, 96], sizes = [8, 32], strides = [1, 1]} : vector<8x128xf32> to vector<8x32xf32>
    %175 = arith.mulf %172, %108 : vector<8x32xf32>
    %176 = arith.mulf %171, %173 : vector<8x32xf32>
    %177 = arith.addf %175, %176 : vector<8x32xf32>
    %178 = math.tanh %177 : vector<8x32xf32>
    %179 = arith.mulf %174, %178 : vector<8x32xf32>
    %cst_54 = arith.constant dense<0.000000e+00> : vector<8x32xf32>
    %180 = tpu.matmul %179, %5, %cst_54 {dimension_numbers = #tpu.dot_dimension_numbers<[1], [0], [0], [1], [0, 0, 1, 1], [], []>} : vector<8x32xf32>, vector<32x32xf32>, vector<8x32xf32> -> vector<8x32xf32>
    %181 = vector.broadcast %6 : vector<1x32xf32> to vector<8x32xf32>
    %182 = arith.addf %180, %181 : vector<8x32xf32>
    %183 = vector.extract_strided_slice %182 {offsets = [0, 0], sizes = [8, 16], strides = [1, 1]} : vector<8x32xf32> to vector<8x16xf32>
    %184 = vector.extract_strided_slice %182 {offsets = [0, 16], sizes = [8, 16], strides = [1, 1]} : vector<8x32xf32> to vector<8x16xf32>
    %185 = math.exp %184 : vector<8x16xf32>
    %186 = arith.index_cast %c2_i32 : i32 to index
    %c0_55 = arith.constant 0 : index
    %c0_56 = arith.constant 0 : index
    %187 = vector.load %arg1[%186, %c0_55, %c0_56] : memref<4x8x16xf32, #tpu.memory_space<vmem>>, vector<1x8x16xf32>
    %188 = vector.shape_cast %187 : vector<1x8x16xf32> to vector<8x16xf32>
    %189 = arith.mulf %185, %188 : vector<8x16xf32>
    %190 = arith.addf %183, %189 : vector<8x16xf32>
    %191 = tpu.concatenate %190, %140 in 1 : vector<8x16xf32>, vector<8x32xf32> -> vector<8x48xf32>
    %cst_57 = arith.constant dense<0.000000e+00> : vector<8x128xf32>
    %192 = tpu.matmul %191, %3, %cst_57 {dimension_numbers = #tpu.dot_dimension_numbers<[1], [0], [0], [1], [0, 0, 1, 1], [], []>} : vector<8x48xf32>, vector<48x128xf32>, vector<8x128xf32> -> vector<8x128xf32>
    %193 = vector.broadcast %4 : vector<1x128xf32> to vector<8x128xf32>
    %194 = arith.addf %192, %193 : vector<8x128xf32>
    %195 = arith.negf %194 : vector<8x128xf32>
    %196 = math.exp %195 : vector<8x128xf32>
    %cst_58 = arith.constant 1.000000e+00 : f32
    %197 = vector.broadcast %cst_58 : f32 to vector<8x128xf32>
    %198 = arith.addf %197, %196 : vector<8x128xf32>
    %199 = arith.divf %197, %198 : vector<8x128xf32>
    %200 = math.tanh %194 : vector<8x128xf32>
    %201 = vector.extract_strided_slice %199 {offsets = [0, 0], sizes = [8, 32], strides = [1, 1]} : vector<8x128xf32> to vector<8x32xf32>
    %202 = vector.extract_strided_slice %199 {offsets = [0, 32], sizes = [8, 32], strides = [1, 1]} : vector<8x128xf32> to vector<8x32xf32>
    %203 = vector.extract_strided_slice %200 {offsets = [0, 64], sizes = [8, 32], strides = [1, 1]} : vector<8x128xf32> to vector<8x32xf32>
    %204 = vector.extract_strided_slice %199 {offsets = [0, 96], sizes = [8, 32], strides = [1, 1]} : vector<8x128xf32> to vector<8x32xf32>
    %205 = arith.mulf %202, %138 : vector<8x32xf32>
    %206 = arith.mulf %201, %203 : vector<8x32xf32>
    %207 = arith.addf %205, %206 : vector<8x32xf32>
    %208 = math.tanh %207 : vector<8x32xf32>
    %209 = arith.mulf %204, %208 : vector<8x32xf32>
    %cst_59 = arith.constant dense<0.000000e+00> : vector<8x128xf32>
    %210 = tpu.matmul %209, %7, %cst_59 {dimension_numbers = #tpu.dot_dimension_numbers<[1], [0], [0], [1], [0, 0, 1, 1], [], []>} : vector<8x32xf32>, vector<32x128xf32>, vector<8x128xf32> -> vector<8x128xf32>
    %211 = vector.broadcast %8 : vector<1x128xf32> to vector<8x128xf32>
    %212 = arith.addf %210, %211 : vector<8x128xf32>
    %cst_60 = arith.constant 0.000000e+00 : f32
    %213 = vector.broadcast %cst_60 : f32 to vector<8x16xf32>
    %214 = arith.subf %213, %184 : vector<8x16xf32>
    %215 = arith.mulf %185, %185 : vector<8x16xf32>
    %216 = arith.mulf %183, %183 : vector<8x16xf32>
    %217 = arith.addf %215, %216 : vector<8x16xf32>
    %cst_61 = arith.constant 5.000000e-01 : f32
    %218 = vector.broadcast %cst_61 : f32 to vector<8x16xf32>
    %219 = arith.mulf %218, %217 : vector<8x16xf32>
    %220 = arith.addf %214, %219 : vector<8x16xf32>
    %cst_62 = arith.constant 5.000000e-01 : f32
    %221 = vector.broadcast %cst_62 : f32 to vector<8x16xf32>
    %222 = arith.subf %220, %221 : vector<8x16xf32>
    %223 = arith.addf %154, %222 : vector<8x16xf32>
    %c3_i32 = arith.constant 3 : i32
    %224 = arith.negf %212 : vector<8x128xf32>
    %225 = math.exp %224 : vector<8x128xf32>
    %cst_63 = arith.constant 1.000000e+00 : f32
    %226 = vector.broadcast %cst_63 : f32 to vector<8x128xf32>
    %227 = arith.addf %226, %225 : vector<8x128xf32>
    %228 = arith.divf %226, %227 : vector<8x128xf32>
    %cst_64 = arith.constant dense<0.000000e+00> : vector<8x128xf32>
    %229 = tpu.matmul %228, %1, %cst_64 {dimension_numbers = #tpu.dot_dimension_numbers<[1], [0], [0], [1], [0, 0, 1, 1], [], []>} : vector<8x128xf32>, vector<128x128xf32>, vector<8x128xf32> -> vector<8x128xf32>
    %230 = arith.subf %13, %229 : vector<8x128xf32>
    %231 = tpu.concatenate %209, %179 in 1 : vector<8x32xf32>, vector<8x32xf32> -> vector<8x64xf32>
    %cst_65 = arith.constant dense<0.000000e+00> : vector<8x128xf32>
    %232 = tpu.matmul %231, %2, %cst_65 {dimension_numbers = #tpu.dot_dimension_numbers<[1], [0], [0], [1], [0, 0, 1, 1], [], []>} : vector<8x64xf32>, vector<64x128xf32>, vector<8x128xf32> -> vector<8x128xf32>
    %233 = arith.addf %230, %232 : vector<8x128xf32>
    %234 = arith.negf %233 : vector<8x128xf32>
    %235 = math.exp %234 : vector<8x128xf32>
    %cst_66 = arith.constant 1.000000e+00 : f32
    %236 = vector.broadcast %cst_66 : f32 to vector<8x128xf32>
    %237 = arith.addf %236, %235 : vector<8x128xf32>
    %238 = arith.divf %236, %237 : vector<8x128xf32>
    %239 = math.tanh %233 : vector<8x128xf32>
    %240 = vector.extract_strided_slice %238 {offsets = [0, 0], sizes = [8, 32], strides = [1, 1]} : vector<8x128xf32> to vector<8x32xf32>
    %241 = vector.extract_strided_slice %238 {offsets = [0, 32], sizes = [8, 32], strides = [1, 1]} : vector<8x128xf32> to vector<8x32xf32>
    %242 = vector.extract_strided_slice %239 {offsets = [0, 64], sizes = [8, 32], strides = [1, 1]} : vector<8x128xf32> to vector<8x32xf32>
    %243 = vector.extract_strided_slice %238 {offsets = [0, 96], sizes = [8, 32], strides = [1, 1]} : vector<8x128xf32> to vector<8x32xf32>
    %244 = arith.mulf %241, %177 : vector<8x32xf32>
    %245 = arith.mulf %240, %242 : vector<8x32xf32>
    %246 = arith.addf %244, %245 : vector<8x32xf32>
    %247 = math.tanh %246 : vector<8x32xf32>
    %248 = arith.mulf %243, %247 : vector<8x32xf32>
    %cst_67 = arith.constant dense<0.000000e+00> : vector<8x32xf32>
    %249 = tpu.matmul %248, %5, %cst_67 {dimension_numbers = #tpu.dot_dimension_numbers<[1], [0], [0], [1], [0, 0, 1, 1], [], []>} : vector<8x32xf32>, vector<32x32xf32>, vector<8x32xf32> -> vector<8x32xf32>
    %250 = vector.broadcast %6 : vector<1x32xf32> to vector<8x32xf32>
    %251 = arith.addf %249, %250 : vector<8x32xf32>
    %252 = vector.extract_strided_slice %251 {offsets = [0, 0], sizes = [8, 16], strides = [1, 1]} : vector<8x32xf32> to vector<8x16xf32>
    %253 = vector.extract_strided_slice %251 {offsets = [0, 16], sizes = [8, 16], strides = [1, 1]} : vector<8x32xf32> to vector<8x16xf32>
    %254 = math.exp %253 : vector<8x16xf32>
    %255 = arith.index_cast %c3_i32 : i32 to index
    %c0_68 = arith.constant 0 : index
    %c0_69 = arith.constant 0 : index
    %256 = vector.load %arg1[%255, %c0_68, %c0_69] : memref<4x8x16xf32, #tpu.memory_space<vmem>>, vector<1x8x16xf32>
    %257 = vector.shape_cast %256 : vector<1x8x16xf32> to vector<8x16xf32>
    %258 = arith.mulf %254, %257 : vector<8x16xf32>
    %259 = arith.addf %252, %258 : vector<8x16xf32>
    %260 = tpu.concatenate %259, %209 in 1 : vector<8x16xf32>, vector<8x32xf32> -> vector<8x48xf32>
    %cst_70 = arith.constant dense<0.000000e+00> : vector<8x128xf32>
    %261 = tpu.matmul %260, %3, %cst_70 {dimension_numbers = #tpu.dot_dimension_numbers<[1], [0], [0], [1], [0, 0, 1, 1], [], []>} : vector<8x48xf32>, vector<48x128xf32>, vector<8x128xf32> -> vector<8x128xf32>
    %262 = vector.broadcast %4 : vector<1x128xf32> to vector<8x128xf32>
    %263 = arith.addf %261, %262 : vector<8x128xf32>
    %264 = arith.negf %263 : vector<8x128xf32>
    %265 = math.exp %264 : vector<8x128xf32>
    %cst_71 = arith.constant 1.000000e+00 : f32
    %266 = vector.broadcast %cst_71 : f32 to vector<8x128xf32>
    %267 = arith.addf %266, %265 : vector<8x128xf32>
    %268 = arith.divf %266, %267 : vector<8x128xf32>
    %269 = math.tanh %263 : vector<8x128xf32>
    %270 = vector.extract_strided_slice %268 {offsets = [0, 0], sizes = [8, 32], strides = [1, 1]} : vector<8x128xf32> to vector<8x32xf32>
    %271 = vector.extract_strided_slice %268 {offsets = [0, 32], sizes = [8, 32], strides = [1, 1]} : vector<8x128xf32> to vector<8x32xf32>
    %272 = vector.extract_strided_slice %269 {offsets = [0, 64], sizes = [8, 32], strides = [1, 1]} : vector<8x128xf32> to vector<8x32xf32>
    %273 = vector.extract_strided_slice %268 {offsets = [0, 96], sizes = [8, 32], strides = [1, 1]} : vector<8x128xf32> to vector<8x32xf32>
    %274 = arith.mulf %271, %207 : vector<8x32xf32>
    %275 = arith.mulf %270, %272 : vector<8x32xf32>
    %276 = arith.addf %274, %275 : vector<8x32xf32>
    %277 = math.tanh %276 : vector<8x32xf32>
    %278 = arith.mulf %273, %277 : vector<8x32xf32>
    %cst_72 = arith.constant dense<0.000000e+00> : vector<8x128xf32>
    %279 = tpu.matmul %278, %7, %cst_72 {dimension_numbers = #tpu.dot_dimension_numbers<[1], [0], [0], [1], [0, 0, 1, 1], [], []>} : vector<8x32xf32>, vector<32x128xf32>, vector<8x128xf32> -> vector<8x128xf32>
    %280 = vector.broadcast %8 : vector<1x128xf32> to vector<8x128xf32>
    %281 = arith.addf %279, %280 : vector<8x128xf32>
    %cst_73 = arith.constant 0.000000e+00 : f32
    %282 = vector.broadcast %cst_73 : f32 to vector<8x16xf32>
    %283 = arith.subf %282, %253 : vector<8x16xf32>
    %284 = arith.mulf %254, %254 : vector<8x16xf32>
    %285 = arith.mulf %252, %252 : vector<8x16xf32>
    %286 = arith.addf %284, %285 : vector<8x16xf32>
    %cst_74 = arith.constant 5.000000e-01 : f32
    %287 = vector.broadcast %cst_74 : f32 to vector<8x16xf32>
    %288 = arith.mulf %287, %286 : vector<8x16xf32>
    %289 = arith.addf %283, %288 : vector<8x16xf32>
    %cst_75 = arith.constant 5.000000e-01 : f32
    %290 = vector.broadcast %cst_75 : f32 to vector<8x16xf32>
    %291 = arith.subf %289, %290 : vector<8x16xf32>
    %292 = arith.addf %223, %291 : vector<8x16xf32>
    %c4_i32 = arith.constant 4 : i32
    %c0_76 = arith.constant 0 : index
    %c0_77 = arith.constant 0 : index
    %293 = vector.load %arg12[%c0_76, %c0_77] : memref<128x128xf32, #tpu.memory_space<vmem>>, vector<128x128xf32>
    %cst_78 = arith.constant dense<0.000000e+00> : vector<8x128xf32>
    %294 = tpu.matmul %281, %293, %cst_78 {dimension_numbers = #tpu.dot_dimension_numbers<[1], [0], [0], [1], [0, 0, 1, 1], [], []>} : vector<8x128xf32>, vector<128x128xf32>, vector<8x128xf32> -> vector<8x128xf32>
    %c0_79 = arith.constant 0 : index
    %c0_80 = arith.constant 0 : index
    %295 = vector.load %arg13[%c0_79, %c0_80] : memref<1x128xf32, #tpu.memory_space<vmem>>, vector<1x128xf32>
    %296 = vector.broadcast %295 : vector<1x128xf32> to vector<8x128xf32>
    %297 = arith.addf %294, %296 : vector<8x128xf32>
    %c0_81 = arith.constant 0 : index
    %c0_82 = arith.constant 0 : index
    %298 = vector.load %arg14[%c0_81, %c0_82] : memref<8x128xf32, #tpu.memory_space<vmem>>, vector<8x128xf32>
    tpu.vector_store %arg14[%c0_81, %c0_82], %297 {strides = array<i32>} : memref<8x128xf32, #tpu.memory_space<vmem>>, vector<8x128xf32>,
    %cst_83 = arith.constant 0.000000e+00 : f32
    %299 = vector.broadcast %cst_83 : f32 to vector<8x112xf32>
    %300 = tpu.concatenate %292, %299 in 1 : vector<8x16xf32>, vector<8x112xf32> -> vector<8x128xf32>
    %c0_84 = arith.constant 0 : index
    %c0_85 = arith.constant 0 : index
    %301 = vector.load %arg15[%c0_84, %c0_85] : memref<8x128xf32, #tpu.memory_space<vmem>>, vector<8x128xf32>
    tpu.vector_store %arg15[%c0_84, %c0_85], %300 {strides = array<i32>} : memref<8x128xf32, #tpu.memory_space<vmem>>, vector<8x128xf32>,
    return
  }
}

</mosaic_0001>

<bundles_post_ra>
// kernel: draw3_forward.1
= control target key start
LH: loop header
LB: loop body
LE: loop exit
PB: predicated region body
PF: predicated region fallthrough
CT: control target
= control target key end

     0   :  { %21 = vsyncpa [#allocation3], 0  ;;  %v3246_v3 = vmov 0.0|0.0   ;;  %vm3247_vm0 = vmmov 0   ;;  %v3248_v11 = vmov 0.0   ;;  %s4025_s0 = inlined_call_operand.vmem [shape: f32[8,128], index: 0, kind: input, shape index: {}]   ;;  %s4026_s1 = inlined_call_operand.vmem [shape: f32[4,8,16], index: 1, kind: input, shape index: {}]   ;;  %s4027_s2 = inlined_call_operand.vmem [shape: f32[128,128], index: 2, kind: input, shape index: {}]   ;;  %s4028_s3 = inlined_call_operand.vmem [shape: f32[128,128], index: 3, kind: input, shape index: {}]   ;;  %s4029_s4 = inlined_call_operand.vmem [shape: f32[64,128], index: 4, kind: input, shape index: {}]   ;;  %s4030_s5 = inlined_call_operand.vmem [shape: f32[1,128], index: 5, kind: input, shape index: {}]   ;;  %s4031_s6 = inlined_call_operand.vmem [shape: f32[48,128], index: 6, kind: input, shape index: {}]   ;;  %s4032_s7 = inlined_call_operand.vmem [shape: f32[1,128], index: 7, kind: input, shape index: {}]   ;;  %s4033_s8 = inlined_call_operand.vmem [shape: f32[32,32], index: 8, kind: input, shape index: {}]   ;;  %s4034_s9 = inlined_call_operand.vmem [shape: f32[1,32], index: 9, kind: input, shape index: {}]   ;;  %s4035_s10 = inlined_call_operand.vmem [shape: f32[32,128], index: 10, kind: input, shape index: {}]   ;;  %s4036_s11 = inlined_call_operand.vmem [shape: f32[1,128], index: 11, kind: input, shape index: {}]   ;;  %s4037_s12 = inlined_call_operand.vmem [shape: f32[128,128], index: 12, kind: input, shape index: {}]   ;;  %s4038_s13 = inlined_call_operand.vmem [shape: f32[1,128], index: 13, kind: input, shape index: {}]   ;;  %s4039_s14 = inlined_call_operand.hbm [shape: f32[8,128], index: 14, kind: output, shape index: {0}]   ;;  %s4040_s15 = inlined_call_operand.hbm [shape: f32[8,128], index: 15, kind: output, shape index: {1}]  }
   0x1   :  { %v93_v0 = vld [vmem:[%s4027_s2] sm:$0xff]  ;;  %v94_v1 = vld [vmem:[%s4027_s2 + $0x8] sm:$0xff]  ;;  %2827 = vmatprep.subr.bf16.mxu0 %v3246_v3  ;;  %2851 = vmatprep.subr.bf16.mxu1 %v3246_v3  ;;  %v95_v6 = vld [vmem:[%s4027_s2 + $0x10] sm:$0xff] }
   0x2   :  { %v52_v2 = vld [vmem:[%s4028_s3] sm:$0xff]  ;;  %v2828_v4 = vpack.c.bf16 %v94_v1, %v93_v0  ;;  %v53_v5 = vld [vmem:[%s4028_s3 + $0x8] sm:$0xff]  ;;  %v96_v7 = vld [vmem:[%s4027_s2 + $0x18] sm:$0xff]  ;;  %2425 = vmatprep.mubr.msk.f32.mxu0 %vm3247_vm0, %v3248_v11  ;;  %2460 = vmatprep.mubr.msk.f32.mxu1 %vm3247_vm0, %v3248_v11 }
   0x3   :  { %v3357_v8 = vpack.c.bf16 %v53_v5, %v52_v2  ;;  %v54_v9 = vld [vmem:[%s4028_s3 + $0x10] sm:$0xff]  ;;  %v55_v10 = vld [vmem:[%s4028_s3 + $0x18] sm:$0xff]  ;;  %v2831_v12 = vpack.c.bf16 %v96_v7, %v95_v6  ;;  %v97_v14 = vld [vmem:[%s4027_s2 + $0x20] sm:$0xff] }
   0x4   :  { %2829 = vmatpush3.bf16.msra.mxu0 %v2828_v4  ;;  %v3371_v13 = vpack.c.bf16 %v55_v10, %v54_v9  ;;  %v98_v15 = vld [vmem:[%s4027_s2 + $0x28] sm:$0xff]  ;;  %v56_v16 = vld [vmem:[%s4028_s3 + $0x20] sm:$0xff]  ;;  %v99_v20 = vld [vmem:[%s4027_s2 + $0x30] sm:$0xff] }
   0x5   :  { %2853 = vmatpush3.bf16.msra.mxu1 %v3357_v8  ;;  %2830 = vmatprep.subr.bf16.mxu0 %v3246_v3  ;;  %v57_v17 = vld [vmem:[%s4028_s3 + $0x28] sm:$0xff]  ;;  %v2834_v18 = vpack.c.bf16 %v98_v15, %v97_v14  ;;  %v100_v21 = vld [vmem:[%s4027_s2 + $0x38] sm:$0xff]  ;;  %v58_v22 = vld [vmem:[%s4028_s3 + $0x30] sm:$0xff] }
   0x6   :  { %2854 = vmatprep.subr.bf16.mxu1 %v3246_v3  ;;  %v3388_v19 = vpack.c.bf16 %v57_v17, %v56_v16  ;;  %v59_v23 = vld [vmem:[%s4028_s3 + $0x38] sm:$0xff]  ;;  %v2837_v24 = vpack.c.bf16 %v100_v21, %v99_v20  ;;  %v101_v26 = vld [vmem:[%s4027_s2 + $0x40] sm:$0xff]  ;;  %v102_v27 = vld [vmem:[%s4027_s2 + $0x48] sm:$0xff] }
   0x7   :  { %v3405_v25 = vpack.c.bf16 %v59_v23, %v58_v22  ;;  %v60_v28 = vld [vmem:[%s4028_s3 + $0x40] sm:$0xff]  ;;  %v61_v29 = vld [vmem:[%s4028_s3 + $0x48] sm:$0xff] }
   0x8   :  { %2832 = vmatpush3.bf16.msra.mxu0 %v2831_v12 }
   0x9   :  { %2856 = vmatpush3.bf16.msra.mxu1 %v3371_v13  ;;  %2833 = vmatprep.subr.bf16.mxu0 %v3246_v3 }
   0xa   :  { %2857 = vmatprep.subr.bf16.mxu1 %v3246_v3 }
   0xc   :  { %2835 = vmatpush3.bf16.msra.mxu0 %v2834_v18 }
   0xd   :  { %2859 = vmatpush3.bf16.msra.mxu1 %v3388_v19  ;;  %2836 = vmatprep.subr.bf16.mxu0 %v3246_v3 }
   0xe   :  { %2860 = vmatprep.subr.bf16.mxu1 %v3246_v3 }
   0xf   :  { %22 = vsyncpa [#allocation5], 0  ;;  %v2840_v30 = vpack.c.bf16 %v102_v27, %v101_v26  ;;  %v3422_v31 = vpack.c.bf16 %v61_v29, %v60_v28  ;;  %v103_v32 = vld [vmem:[%s4027_s2 + $0x50] sm:$0xff]  ;;  %v104_v33 = vld [vmem:[%s4027_s2 + $0x58] sm:$0xff]  ;;  %v3249_v56 = vmov 0.5   ;;  %s3250_s22 = smov 64  }
  0x10   :  { %2838 = vmatpush3.bf16.msra.mxu0 %v2837_v24  ;;  %v62_v34 = vld [vmem:[%s4028_s3 + $0x50] sm:$0xff]  ;;  %v63_v35 = vld [vmem:[%s4028_s3 + $0x58] sm:$0xff]  ;;  %v2843_v36 = vpack.c.bf16 %v104_v33, %v103_v32  ;;  %v105_v38 = vld [vmem:[%s4027_s2 + $0x60] sm:$0xff]  ;;  %s3252_s16 = smov 16   ;;  %vm365_vm1 = vcmask 261120   ;;  %vm451_vm2 = vcmask 130048  }
  0x11   :  { %2862 = vmatpush3.bf16.msra.mxu1 %v3405_v25  ;;  %2839 = vmatprep.subr.bf16.mxu0 %v3246_v3  ;;  %v3439_v37 = vpack.c.bf16 %v63_v35, %v62_v34  ;;  %v106_v39 = vld [vmem:[%s4027_s2 + $0x68] sm:$0xff]  ;;  %v64_v40 = vld [vmem:[%s4028_s3 + $0x60] sm:$0xff]  ;;  %v107_v44 = vld [vmem:[%s4027_s2 + $0x70] sm:$0xff]  ;;  %vm459_vm3 = vcmask 392192   ;;  %vm257_vm4 = vcmask 523264   ;;  %s3255_s26 = smov [#allocation4]  }
  0x12   :  { %2863 = vmatprep.subr.bf16.mxu1 %v3246_v3  ;;  %v65_v41 = vld [vmem:[%s4028_s3 + $0x68] sm:$0xff]  ;;  %v2846_v42 = vpack.c.bf16 %v106_v39, %v105_v38  ;;  %v108_v45 = vld [vmem:[%s4027_s2 + $0x78] sm:$0xff]  ;;  %v66_v46 = vld [vmem:[%s4028_s3 + $0x70] sm:$0xff]  ;;  %s2137_s27 = sshll.u32 %s3255_s26, 4  ;;  %s2138_s27 = int_to_ptr.vmem [resolvable:$true] %s2137_s27 }
  0x13   :  { %v3456_v43 = vpack.c.bf16 %v65_v41, %v64_v40  ;;  %v67_v47 = vld [vmem:[%s4028_s3 + $0x78] sm:$0xff]  ;;  %v2849_v48 = vpack.c.bf16 %v108_v45, %v107_v44  ;;  %v68_v50 = vld [vmem:[%s4029_s4] sm:$0xff]  ;;  %v69_v51 = vld [vmem:[%s4029_s4 + $0x8] sm:$0xff]  ;;  %p3203_p1 = scmp.lt.s32.totalorder %s2138_s27, %s2138_s27 }
  0x14   :  { %2841 = vmatpush3.bf16.msra.mxu0 %v2840_v30  ;;  %v3473_v49 = vpack.c.bf16 %v67_v47, %v66_v46  ;;  %v51_v52 = vld [vmem:[%s4025_s0] sm:$0xff]  ;;  %v3486_v53 = vpack.c.bf16 %v69_v51, %v68_v50  ;;  %v70_v54 = vld [vmem:[%s4029_s4 + $0x10] sm:$0xff]  ;;  %v71_v55 = vld [vmem:[%s4029_s4 + $0x18] sm:$0xff] }
  0x15   :  { %2865 = vmatpush3.bf16.msra.mxu1 %v3422_v31  ;;  %2842 = vmatprep.subr.bf16.mxu0 %v3246_v3  ;;  %v3499_v57 = vpack.c.bf16 %v71_v55, %v70_v54  ;;  %v72_v58 = vld [vmem:[%s4029_s4 + $0x20] sm:$0xff]  ;;  %v73_v59 = vld [vmem:[%s4029_s4 + $0x28] sm:$0xff]  ;;  %v74_v61 = vld [vmem:[%s4029_s4 + $0x30] sm:$0xff] }
  0x16   :  { %2866 = vmatprep.subr.bf16.mxu1 %v3246_v3  ;;  %v3511_v60 = vpack.c.bf16 %v73_v59, %v72_v58  ;;  %v75_v62 = vld [vmem:[%s4029_s4 + $0x38] sm:$0xff]  ;;  %v2149_v5 = vld [vmem:[%s4030_s5] ss:$0 sm:$0xff]  ;;  %s3251_s5 = smov 32   ;;  %v84_v27 = vld [vmem:[%s4033_s8 + $0x8] sm:$0xff]  ;;  %s3254_s4 = smov 48  }
  0x17   :  { %v3521_v63 = vpack.c.bf16 %v75_v62, %v74_v61  ;;  %v83_v26 = vld [vmem:[%s4033_s8] sm:$0xff]  ;;  %v85_v28 = vld [vmem:[%s4033_s8 + $0x10] sm:$0xff]  ;;  %v86_v30 = vld [vmem:[%s4033_s8 + $0x18] sm:$0xff] }
  0x18   :  { %2844 = vmatpush3.bf16.msra.mxu0 %v2843_v36  ;;  %v3549_v29 = vpack.c.bf16 %v84_v27, %v83_v26  ;;  %v3555_v32 = vpack.c.bf16 %v86_v30, %v85_v28  ;;  %v440_v34 = vld [vmem:[%s4026_s1] sm:$0xff]  ;;  %v77_v40 = vld [vmem:[%s4031_s6 + $0x8] sm:$0xff]  ;;  %v78_v41 = vld [vmem:[%s4031_s6 + $0x10] sm:$0xff] }
  0x19   :  { %2868 = vmatpush3.bf16.msra.mxu1 %v3439_v37  ;;  %2845 = vmatprep.subr.bf16.mxu0 %v3246_v3  ;;  %v76_v39 = vld [vmem:[%s4031_s6] sm:$0xff]  ;;  %v79_v44 = vld [vmem:[%s4031_s6 + $0x18] sm:$0xff] }
  0x1a   :  { %2869 = vmatprep.subr.bf16.mxu1 %v3246_v3  ;;  %v3587_v45 = vpack.c.bf16 %v79_v44, %v78_v41  ;;  %v3595_v46 = vld [vmem:[%s4034_s9] ss:$0 sm:$0xff]  ;;  %s3253_s9 = smov 112   ;;  %v91_v27 = vld [vmem:[%s4035_s10 + $0x18] sm:$0xff] }
  0x1b   :  { %v80_v51 = vld [vmem:[%s4031_s6 + $0x20] sm:$0xff] }
  0x1c   :  { %2847 = vmatpush3.bf16.msra.mxu0 %v2846_v42  ;;  %v3581_v42 = vpack.c.bf16 %v77_v40, %v76_v39  ;;  %v3696_v39 = vld [vmem:[%s4036_s11] ss:$0 sm:$0xff] }
  0x1d   :  { %2871 = vmatpush3.bf16.msra.mxu1 %v3456_v43  ;;  %2848 = vmatprep.subr.bf16.mxu0 %v3246_v3 }
  0x1e   :  { %2872 = vmatprep.subr.bf16.mxu1 %v3246_v3 }
  0x20   :  { %2850 = vmatpush3.bf16.msra.mxu0 %v2849_v48 }
  0x21   :  { %2874 = vmatpush3.bf16.msra.mxu1 %v3473_v49  ;;  %2902 = vmatprep.subr.bf16.mxu0 %v3246_v3 }
  0x22   :  { %2875 = vmatprep.subr.bf16.mxu1 %v3246_v3 }
  0x23   :  { %2426 = vmatmul.mubr.f32.vlgmr.msra.gmra.mrb[0].mxu0 %v51_v52  ;;  %v81_v52 = vld [vmem:[%s4031_s6 + $0x28] sm:$0xff]  ;;  %s3198_s6 = scalar_lea.vmem %s2138_s27, 128 }
  0x24   :  { %2461 = vmatmul.mubr.f32.vlgmr.msra.gmra.mrb[0].mxu1 %v3249_v56  ;;  %2516 = vmatprep.mubr.msk.f32.mxu0 %vm3247_vm0, %v3248_v11  ;;  %v3607_v55 = vpack.c.bf16 %v81_v52, %v80_v51  ;;  %p3199_p0 = scmp.ne.s32.totalorder %s2138_s27, %s3198_s6  ;;  %p3204_p2 = scmp.lt.s32.totalorder %s3198_s6, %s3198_s6 }
  0x25   :  { %2877 = vmatpush3.bf16.msra.mxu1 %v3486_v53  ;;  %2479 = vmatprep.mubr.msk.f32.mxu1 %vm3247_vm0, %v3248_v11 }
  0x26   :  { %2878 = vmatprep.subr.bf16.mxu1 %v3246_v3  ;;  %p3205_p3 = por %p3204_p2, %p3203_p1 }
  0x28   :  { %p3206_p4 = pnand %p3205_p3, %p3199_p0 }
  0x29   :  { %2880 = vmatpush3.bf16.msra.mxu1 %v3499_v57 }
  0x2a   :  { %2881 = vmatprep.subr.bf16.mxu1 %v3246_v3 }
  0x2d   :  { %2883 = vmatpush3.bf16.msra.mxu1 %v3511_v60 }
  0x2e   :  { %2884 = vmatprep.subr.bf16.mxu1 %v3246_v3 }
  0x31   :  { %2886 = vmatpush3.bf16.msra.mxu1 %v3521_v63 }
  0x32   :  { %2887 = vmatprep.subr.bf16.mxu1 %v3246_v3 }
  0x34   :  { %2480 = vmatmul.mubr.f32.vlgmr.msra.gmra.mrb[2].mxu1 %v3248_v11 }
  0x35   :  { %2490 = vmatprep.mubr.msk.f32.mxu1 %vm3247_vm0, %v3248_v11  ;;  %2889 = vmatpush3.bf16.msra.mxu1 %v3549_v29 }
  0x36   :  { %2890 = vmatprep.subr.bf16.mxu1 %v3246_v3 }
  0x39   :  { %2892 = vmatpush3.bf16.msra.mxu1 %v3555_v32 }
  0x3a   :  { %2893 = vmatprep.subr.bf16.mxu1 %v3246_v3 }
  0xf6   :  { %v182_v0 = vpop.f32.mrb[0].mxu0 }
  0xf7   :  { %v252_v1 = vpop.f32.mrb[0].mxu1  ;;  %v2427_v2 = vpop.f32.mrb[1].mxu0  ;;  %v3532_v6 = vadd.f32 %v2149_v5, %v182_v0 }
  0xf8   :  { %v2462_v4 = vpop.f32.mrb[1].mxu1 }
  0xf9   :  { %v256_v7 = vsub.f32 %v3532_v6, %v252_v1  ;;  %v3639_v1 = vld [vmem:[%s4032_s7] ss:$0 sm:$0xff] }
 0x107   :  { %v327_v9 = vpop.f32.mrb[2].mxu1 }
 0x108   :  { %v331_v10 = vadd.f32 %v327_v9, %v256_v7  ;;  %v2481_v12 = vpop.f32.mrb[3].mxu1 }
 0x10a   :  { %3114 = vtanh.f32 %v331_v10  ;;  %v2150_v15 = vmul.f32 -1.442695, %v331_v10 }
 0x10c   :  { %3116 = vpow2.f32 %v2150_v15 }
 0x114   :  { %v3115_v14 = vpop.eup %3114 }
 0x115   :  { %341 = vrot.lane.b32.xlu0 %v3115_v14, %s3250_s22 }
 0x116   :  { %v3117_v16 = vpop.eup %3116 }
 0x117   :  { %v335_v17 = vadd.f32 1.0, %v3117_v16 }
 0x119   :  { %3118 = vrcp.f32 %v335_v17 }
 0x123   :  { %v3119_v18 = vpop.eup %3118 }
 0x124   :  { %v339_v22 = vmul.f32 0.0, %v3119_v18 }
 0x187   :  { %v342_v20 = vpop.permute.xlu0 %341 }
 0x188   :  { %v344_v21 = vmul.f32 %v3119_v18, %v342_v20 }
 0x18a   :  { %346 = vrot.lane.b32.xlu0 %v344_v21, %s3251_s5  ;;  %v88_v21 = vld [vmem:[%s4035_s10] sm:$0xff] }
 0x18e   :  { %442 = vrot.lane.b32.xlu0 %v440_v34, %s3252_s16 }
 0x1fc   :  { %v347_v23 = vpop.permute.xlu0 %346 }
 0x1fd   :  { %v3537_v24 = vadd.f32 %v347_v23, %v339_v22  ;;  %v89_v22 = vld [vmem:[%s4035_s10 + $0x8] sm:$0xff]  ;;  %v90_v23 = vld [vmem:[%s4035_s10 + $0x10] sm:$0xff] }
 0x1fe   :  { %v3656_v26 = vpack.c.bf16 %v89_v22, %v88_v21  ;;  %v3662_v28 = vpack.c.bf16 %v91_v27, %v90_v23 }
 0x1ff   :  { %3120 = vtanh.f32 %v3537_v24 }
 0x200   :  { %v443_v56 = vpop.permute.xlu0 %442  ;;  %2904 = vmatpush3.bf16.msra.mxu0 %v3656_v26 }
 0x201   :  { %2905 = vmatprep.subr.bf16.mxu0 %v3246_v3 }
 0x204   :  { %2907 = vmatpush3.bf16.msra.mxu0 %v3662_v28 }
 0x205   :  { %2932 = vmatprep.subr.bf16.mxu0 %v3246_v3 }
 0x209   :  { %v3121_v33 = vpop.eup %3120 }
 0x20a   :  { %352 = vrot.lane.b32.xlu1 %v3121_v33, %s3250_s22 }
 0x27c   :  { %v353_v35 = vpop.permute.xlu1 %352 }
 0x27d   :  { %v3565_v36 = vmul.f32 %v3119_v18, %v353_v35 }
 0x27f   :  { %363 = vrot.lane.b32.xlu1 %v3565_v36, %s3251_s5 }
 0x2f1   :  { %v364_v38 = vpop.permute.xlu1 %363 }
 0x2f2   :  { %2491 = vmatmul.mubr.msk.f32.vlgmr.msra.gmra.mrb[4].mxu1 %vm365_vm1, %v364_v38 }
 0x2f3   :  { %2505 = vmatprep.mubr.msk.f32.mxu1 %vm3247_vm0, %v3248_v11  ;;  %2895 = vmatpush3.bf16.msra.mxu1 %v3581_v42 }
 0x2f4   :  { %2896 = vmatprep.subr.bf16.mxu1 %v3246_v3 }
 0x2f7   :  { %2898 = vmatpush3.bf16.msra.mxu1 %v3587_v45 }
 0x2f8   :  { %2899 = vmatprep.subr.bf16.mxu1 %v3246_v3 }
 0x2fb   :  { %2901 = vmatpush3.bf16.msra.mxu1 %v3607_v55 }
 0x2fc   :  { %2908 = vmatprep.subr.bf16.mxu1 %v3246_v3 }
 0x3c5   :  { %v434_v47 = vpop.f32.mrb[4].mxu1 }
 0x3c6   :  { %v3598_v48 = vadd.f32 %v3595_v46, %v434_v47  ;;  %v2492_v50 = vpop.f32.mrb[5].mxu1 }
 0x3c8   :  { %v438_v54 = vmul.f32 1.442695, %v3598_v48 }
 0x3ca   :  { %3122 = vpow2.f32 %v438_v54 }
 0x3d4   :  { %v3611_v58 = vpop.eup %3122 }
 0x3d5   :  { %v445_v59 = vmul.f32 %v3611_v58, %v443_v56 }
 0x3d7   :  { %447 = vrot.lane.b32.xlu1 %v445_v59, %s3253_s9 }
 0x449   :  { %v448_v61 = vpop.permute.xlu1 %447 }
 0x44a   :  { %v450_v62 = vadd.f32 %v448_v61, %v3598_v48 }
 0x44c   :  { %v452_v0 = vsel %vm451_vm2, %v450_v62, 0.0 }
 0x44d   :  { %2506 = vmatmul.mubr.msk.f32.vlgmr.msra.gmra.mrb[6].mxu1 %vm459_vm3, %v452_v0 }
 0x44e   :  { %2910 = vmatpush3.bf16.msra.mxu1 %v3357_v8  ;;  %2551 = vmatprep.mubr.msk.f32.mxu1 %vm3247_vm0, %v3248_v11 }
 0x44f   :  { %2911 = vmatprep.subr.bf16.mxu1 %v3246_v3 }
 0x452   :  { %2913 = vmatpush3.bf16.msra.mxu1 %v3371_v13 }
 0x453   :  { %2914 = vmatprep.subr.bf16.mxu1 %v3246_v3 }
 0x456   :  { %2916 = vmatpush3.bf16.msra.mxu1 %v3388_v19 }
 0x457   :  { %2917 = vmatprep.subr.bf16.mxu1 %v3246_v3 }
 0x45a   :  { %2919 = vmatpush3.bf16.msra.mxu1 %v3405_v25 }
 0x45b   :  { %2920 = vmatprep.subr.bf16.mxu1 %v3246_v3 }
 0x45e   :  { %2922 = vmatpush3.bf16.msra.mxu1 %v3422_v31 }
 0x45f   :  { %2923 = vmatprep.subr.bf16.mxu1 %v3246_v3 }
 0x462   :  { %2925 = vmatpush3.bf16.msra.mxu1 %v3439_v37 }
 0x463   :  { %2926 = vmatprep.subr.bf16.mxu1 %v3246_v3 }
 0x466   :  { %2928 = vmatpush3.bf16.msra.mxu1 %v3456_v43 }
 0x467   :  { %2929 = vmatprep.subr.bf16.mxu1 %v3246_v3 }
 0x46a   :  { %2931 = vmatpush3.bf16.msra.mxu1 %v3473_v49 }
 0x46b   :  { %2959 = vmatprep.subr.bf16.mxu1 %v3246_v3 }
 0x520   :  { %v529_v2 = vpop.f32.mrb[6].mxu1 }
 0x521   :  { %v530_v4 = vadd.f32 %v3639_v1, %v529_v2  ;;  %v2507_v5 = vpop.f32.mrb[7].mxu1 }
 0x523   :  { %3124 = vtanh.f32 %v530_v4  ;;  %v2155_v9 = vmul.f32 -1.442695, %v530_v4 }
 0x525   :  { %3126 = vpow2.f32 %v2155_v9 }
 0x52d   :  { %v3125_v7 = vpop.eup %3124 }
 0x52e   :  { %542 = vrot.lane.b32.xlu0 %v3125_v7, %s3250_s22 }
 0x52f   :  { %v3127_v10 = vpop.eup %3126 }
 0x530   :  { %v536_v12 = vadd.f32 1.0, %v3127_v10 }
 0x532   :  { %3128 = vrcp.f32 %v536_v12 }
 0x53c   :  { %v3129_v14 = vpop.eup %3128 }
 0x53d   :  { %v540_v17 = vmul.f32 0.0, %v3129_v14 }
 0x5a0   :  { %v543_v15 = vpop.permute.xlu0 %542 }
 0x5a1   :  { %v545_v16 = vmul.f32 %v3129_v14, %v543_v15 }
 0x5a3   :  { %547 = vrot.lane.b32.xlu1 %v545_v16, %s3251_s5 }
 0x615   :  { %v548_v18 = vpop.permute.xlu1 %547 }
 0x616   :  { %v3644_v20 = vadd.f32 %v548_v18, %v540_v17  ;;  %v2163_v18 = vld [vmem:[%s4026_s1 + $0x8] sm:$0xff] }
 0x618   :  { %3130 = vtanh.f32 %v3644_v20 }
 0x622   :  { %v3131_v30 = vpop.eup %3130 }
 0x623   :  { %553 = vrot.lane.b32.xlu0 %v3131_v30, %s3250_s22 }
 0x627   :  { %728 = vrot.lane.b32.xlu0 %v3565_v36, %s3250_s22 }
 0x695   :  { %v554_v33 = vpop.permute.xlu0 %553 }
 0x696   :  { %v3670_v34 = vmul.f32 %v3129_v14, %v554_v33 }
 0x698   :  { %564 = vrot.lane.b32.xlu1 %v3670_v34, %s3251_s5 }
 0x699   :  { %v729_v36 = vpop.permute.xlu0 %728 }
 0x70a   :  { %v565_v35 = vpop.permute.xlu1 %564 }
 0x70b   :  { %2517 = vmatmul.mubr.msk.f32.vlgmr.msra.gmra.mrb[2].mxu0 %vm365_vm1, %v565_v35  ;;  %v731_v38 = vsel %vm365_vm1, %v565_v35, %v729_v36 }
 0x70c   :  { %2934 = vmatpush3.bf16.msra.mxu0 %v3486_v53  ;;  %2570 = vmatprep.mubr.msk.f32.mxu0 %vm3247_vm0, %v3248_v11 }
 0x70d   :  { %2935 = vmatprep.subr.bf16.mxu0 %v3246_v3 }
 0x710   :  { %2937 = vmatpush3.bf16.msra.mxu0 %v3499_v57 }
 0x711   :  { %2938 = vmatprep.subr.bf16.mxu0 %v3246_v3 }
 0x714   :  { %2940 = vmatpush3.bf16.msra.mxu0 %v3511_v60 }
 0x715   :  { %2941 = vmatprep.subr.bf16.mxu0 %v3246_v3 }
 0x718   :  { %2943 = vmatpush3.bf16.msra.mxu0 %v3521_v63 }
 0x719   :  { %2944 = vmatprep.subr.bf16.mxu0 %v3246_v3 }
 0x71b   :  { %2571 = vmatmul.mubr.msk.f32.vlgmr.msra.gmra.mrb[4].mxu0 %vm257_vm4, %v731_v38 }
 0x71c   :  { %2946 = vmatpush3.bf16.msra.mxu0 %v3549_v29  ;;  %2581 = vmatprep.mubr.msk.f32.mxu0 %vm3247_vm0, %v3248_v11 }
 0x71d   :  { %2947 = vmatprep.subr.bf16.mxu0 %v3246_v3 }
 0x720   :  { %2949 = vmatpush3.bf16.msra.mxu0 %v3555_v32 }
 0x721   :  { %2950 = vmatprep.subr.bf16.mxu0 %v3246_v3 }
 0x7de   :  { %v634_v40 = vpop.f32.mrb[2].mxu0 }
 0x7df   :  { %v635_v41 = vadd.f32 %v3696_v39, %v634_v40  ;;  %v2518_v44 = vpop.f32.mrb[3].mxu0 }
 0x7e1   :  { %v2159_v47 = vmul.f32 -1.442695, %v635_v41 }
 0x7e3   :  { %3132 = vpow2.f32 %v2159_v47 }
 0x7ed   :  { %v3133_v50 = vpop.eup %3132 }
 0x7ee   :  { %v653_v51 = vadd.f32 1.0, %v3133_v50  ;;  %v801_v52 = vpop.f32.mrb[4].mxu0 }
 0x7ef   :  { %v2572_v54 = vpop.f32.mrb[5].mxu0 }
 0x7f0   :  { %3134 = vrcp.f32 %v653_v51 }
 0x7fa   :  { %v3135_v56 = vpop.eup %3134 }
 0x7fb   :  { %2552 = vmatmul.mubr.f32.vlgmr.msra.gmra.mrb[8].mxu1 %v3135_v56 }
 0x7fc   :  { %2961 = vmatpush3.bf16.msra.mxu1 %v3656_v26  ;;  %2607 = vmatprep.mubr.msk.f32.mxu1 %vm3247_vm0, %v3248_v11 }
 0x7fd   :  { %2962 = vmatprep.subr.bf16.mxu1 %v3246_v3 }
 0x800   :  { %2964 = vmatpush3.bf16.msra.mxu1 %v3662_v28 }
 0x801   :  { %2989 = vmatprep.subr.bf16.mxu1 %v3246_v3 }
 0x8ce   :  { %v722_v59 = vpop.f32.mrb[8].mxu1 }
 0x8cf   :  { %v726_v61 = vsub.f32 %v3532_v6, %v722_v59  ;;  %v2553_v62 = vpop.f32.mrb[9].mxu1 }
 0x8d1   :  { %v805_v0 = vadd.f32 %v801_v52, %v726_v61 }
 0x8d3   :  { %3136 = vtanh.f32 %v805_v0  ;;  %v2161_v4 = vmul.f32 -1.442695, %v805_v0 }
 0x8d5   :  { %3138 = vpow2.f32 %v2161_v4 }
 0x8dd   :  { %v3137_v2 = vpop.eup %3136 }
 0x8de   :  { %815 = vrot.lane.b32.xlu1 %v3137_v2, %s3250_s22 }
 0x8df   :  { %v3139_v5 = vpop.eup %3138 }
 0x8e0   :  { %v809_v7 = vadd.f32 1.0, %v3139_v5 }
 0x8e2   :  { %3140 = vrcp.f32 %v809_v7 }
 0x8ec   :  { %v3141_v9 = vpop.eup %3140 }
 0x8ed   :  { %v813_v14 = vmul.f32 %v3141_v9, %v3537_v24 }
 0x950   :  { %v816_v10 = vpop.permute.xlu1 %815 }
 0x951   :  { %v818_v12 = vmul.f32 %v3141_v9, %v816_v10 }
 0x953   :  { %820 = vrot.lane.b32.xlu0 %v818_v12, %s3251_s5 }
 0x9c5   :  { %v821_v15 = vpop.permute.xlu0 %820 }
 0x9c6   :  { %v3709_v16 = vadd.f32 %v821_v15, %v813_v14 }
 0x9c8   :  { %3142 = vtanh.f32 %v3709_v16 }
 0x9d2   :  { %v3143_v17 = vpop.eup %3142 }
 0x9d3   :  { %826 = vrot.lane.b32.xlu1 %v3143_v17, %s3250_s22 }
 0x9d7   :  { %910 = vrot.lane.b32.xlu1 %v2163_v18, %s3252_s16 }
 0x9db   :  { %919 = vrot.lane.b32.xlu1 %v3670_v34, %s3254_s4 }
 0xa45   :  { %v827_v21 = vpop.permute.xlu1 %826 }
 0xa46   :  { %v829_v24 = vmul.f32 %v3141_v9, %v827_v21 }
 0xa48   :  { %831 = vrot.lane.b32.xlu0 %v829_v24, %s3251_s5 }
 0xa49   :  { %v911_v35 = vpop.permute.xlu1 %910 }
 0xa4d   :  { %v920_v41 = vpop.permute.xlu1 %919 }
 0xaba   :  { %v832_v22 = vpop.permute.xlu0 %831 }
 0xabb   :  { %2582 = vmatmul.mubr.msk.f32.vlgmr.msra.gmra.mrb[6].mxu0 %vm365_vm1, %v832_v22 }
 0xabc   :  { %2952 = vmatpush3.bf16.msra.mxu0 %v3581_v42  ;;  %2596 = vmatprep.mubr.msk.f32.mxu0 %vm3247_vm0, %v3248_v11 }
 0xabd   :  { %2953 = vmatprep.subr.bf16.mxu0 %v3246_v3 }
 0xac0   :  { %2955 = vmatpush3.bf16.msra.mxu0 %v3587_v45 }
 0xac1   :  { %2956 = vmatprep.subr.bf16.mxu0 %v3246_v3 }
 0xac4   :  { %2958 = vmatpush3.bf16.msra.mxu0 %v3607_v55 }
 0xac5   :  { %2965 = vmatprep.subr.bf16.mxu0 %v3246_v3 }
 0xb8e   :  { %v901_v23 = vpop.f32.mrb[6].mxu0 }
 0xb8f   :  { %v3730_v27 = vadd.f32 %v3595_v46, %v901_v23  ;;  %v2583_v30 = vpop.f32.mrb[7].mxu0 }
 0xb91   :  { %v905_v33 = vmul.f32 1.442695, %v3730_v27 }
 0xb93   :  { %3144 = vpow2.f32 %v905_v33 }
 0xb9d   :  { %v3733_v34 = vpop.eup %3144 }
 0xb9e   :  { %v913_v36 = vmul.f32 %v3733_v34, %v911_v35 }
 0xba0   :  { %915 = vrot.lane.b32.xlu0 %v913_v36, %s3253_s9 }
 0xc12   :  { %v916_v38 = vpop.permute.xlu0 %915 }
 0xc13   :  { %v918_v40 = vadd.f32 %v916_v38, %v3730_v27 }
 0xc15   :  { %v922_v44 = vsel %vm451_vm2, %v918_v40, %v920_v41 }
 0xc16   :  { %2597 = vmatmul.mubr.msk.f32.vlgmr.msra.gmra.mrb[8].mxu0 %vm459_vm3, %v922_v44 }
 0xc17   :  { %2967 = vmatpush3.bf16.msra.mxu0 %v3357_v8  ;;  %2642 = vmatprep.mubr.msk.f32.mxu0 %vm3247_vm0, %v3248_v11 }
 0xc18   :  { %2968 = vmatprep.subr.bf16.mxu0 %v3246_v3 }
 0xc1b   :  { %2970 = vmatpush3.bf16.msra.mxu0 %v3371_v13 }
 0xc1c   :  { %2971 = vmatprep.subr.bf16.mxu0 %v3246_v3 }
 0xc1f   :  { %2973 = vmatpush3.bf16.msra.mxu0 %v3388_v19 }
 0xc20   :  { %2974 = vmatprep.subr.bf16.mxu0 %v3246_v3 }
 0xc23   :  { %2976 = vmatpush3.bf16.msra.mxu0 %v3405_v25 }
 0xc24   :  { %2977 = vmatprep.subr.bf16.mxu0 %v3246_v3 }
 0xc27   :  { %2979 = vmatpush3.bf16.msra.mxu0 %v3422_v31 }
 0xc28   :  { %2980 = vmatprep.subr.bf16.mxu0 %v3246_v3 }
 0xc2b   :  { %2982 = vmatpush3.bf16.msra.mxu0 %v3439_v37 }
 0xc2c   :  { %2983 = vmatprep.subr.bf16.mxu0 %v3246_v3 }
 0xc2f   :  { %2985 = vmatpush3.bf16.msra.mxu0 %v3456_v43 }
 0xc30   :  { %2986 = vmatprep.subr.bf16.mxu0 %v3246_v3 }
 0xc33   :  { %2988 = vmatpush3.bf16.msra.mxu0 %v3473_v49 }
 0xc34   :  { %3016 = vmatprep.subr.bf16.mxu0 %v3246_v3 }
 0xce9   :  { %v992_v47 = vpop.f32.mrb[8].mxu0 }
 0xcea   :  { %v993_v50 = vadd.f32 %v3639_v1, %v992_v47  ;;  %v2598_v51 = vpop.f32.mrb[9].mxu0 }
 0xcec   :  { %3146 = vtanh.f32 %v993_v50  ;;  %v2165_v54 = vmul.f32 -1.442695, %v993_v50 }
 0xcee   :  { %3148 = vpow2.f32 %v2165_v54 }
 0xcf6   :  { %v3147_v52 = vpop.eup %3146 }
 0xcf7   :  { %1005 = vrot.lane.b32.xlu0 %v3147_v52, %s3250_s22 }
 0xcf8   :  { %v3149_v56 = vpop.eup %3148 }
 0xcf9   :  { %v999_v59 = vadd.f32 1.0, %v3149_v56 }
 0xcfb   :  { %3150 = vrcp.f32 %v999_v59 }
 0xd05   :  { %v3151_v61 = vpop.eup %3150 }
 0xd06   :  { %v1003_v2 = vmul.f32 %v3151_v61, %v3644_v20 }
 0xd69   :  { %v1006_v62 = vpop.permute.xlu0 %1005 }
 0xd6a   :  { %v1008_v0 = vmul.f32 %v3151_v61, %v1006_v62 }
 0xd6c   :  { %1010 = vrot.lane.b32.xlu1 %v1008_v0, %s3251_s5  ;;  %v2172_v0 = vld [vmem:[%s4026_s1 + $0x10] sm:$0xff] }
 0xdde   :  { %v1011_v4 = vpop.permute.xlu1 %1010 }
 0xddf   :  { %v3762_v5 = vadd.f32 %v1011_v4, %v1003_v2 }
 0xde1   :  { %3152 = vtanh.f32 %v3762_v5 }
 0xdeb   :  { %v3153_v7 = vpop.eup %3152 }
 0xdec   :  { %1016 = vrot.lane.b32.xlu0 %v3153_v7, %s3250_s22 }
 0xdf0   :  { %1185 = vrot.lane.b32.xlu0 %v829_v24, %s3250_s22 }
 0xe5e   :  { %v1017_v9 = vpop.permute.xlu0 %1016 }
 0xe5f   :  { %v1019_v10 = vmul.f32 %v3151_v61, %v1017_v9 }
 0xe61   :  { %1021 = vrot.lane.b32.xlu1 %v1019_v10, %s3251_s5 }
 0xe62   :  { %v1186_v20 = vpop.permute.xlu0 %1185 }
 0xed3   :  { %v1022_v12 = vpop.permute.xlu1 %1021 }
 0xed4   :  { %2608 = vmatmul.mubr.msk.f32.vlgmr.msra.gmra.mrb[10].mxu1 %vm365_vm1, %v1022_v12  ;;  %v1188_v14 = vsel %vm365_vm1, %v1022_v12, %v1186_v20 }
 0xed5   :  { %2991 = vmatpush3.bf16.msra.mxu1 %v3486_v53  ;;  %2661 = vmatprep.mubr.msk.f32.mxu1 %vm3247_vm0, %v3248_v11 }
 0xed6   :  { %2992 = vmatprep.subr.bf16.mxu1 %v3246_v3 }
 0xed9   :  { %2994 = vmatpush3.bf16.msra.mxu1 %v3499_v57 }
 0xeda   :  { %2995 = vmatprep.subr.bf16.mxu1 %v3246_v3 }
 0xedd   :  { %2997 = vmatpush3.bf16.msra.mxu1 %v3511_v60 }
 0xede   :  { %2998 = vmatprep.subr.bf16.mxu1 %v3246_v3 }
 0xee1   :  { %3000 = vmatpush3.bf16.msra.mxu1 %v3521_v63 }
 0xee2   :  { %3001 = vmatprep.subr.bf16.mxu1 %v3246_v3 }
 0xee4   :  { %2662 = vmatmul.mubr.msk.f32.vlgmr.msra.gmra.mrb[12].mxu1 %vm257_vm4, %v1188_v14 }
 0xee5   :  { %3003 = vmatpush3.bf16.msra.mxu1 %v3549_v29  ;;  %2672 = vmatprep.mubr.msk.f32.mxu1 %vm3247_vm0, %v3248_v11 }
 0xee6   :  { %3004 = vmatprep.subr.bf16.mxu1 %v3246_v3 }
 0xee9   :  { %3006 = vmatpush3.bf16.msra.mxu1 %v3555_v32 }
 0xeea   :  { %3007 = vmatprep.subr.bf16.mxu1 %v3246_v3 }
 0xfa7   :  { %v1091_v15 = vpop.f32.mrb[10].mxu1 }
 0xfa8   :  { %v1092_v17 = vadd.f32 %v3696_v39, %v1091_v15  ;;  %v2609_v18 = vpop.f32.mrb[11].mxu1 }
 0xfaa   :  { %v2168_v21 = vmul.f32 -1.442695, %v1092_v17 }
 0xfac   :  { %3154 = vpow2.f32 %v2168_v21 }
 0xfb6   :  { %v3155_v24 = vpop.eup %3154 }
 0xfb7   :  { %v1110_v22 = vadd.f32 1.0, %v3155_v24  ;;  %v1258_v23 = vpop.f32.mrb[12].mxu1 }
 0xfb8   :  { %v2663_v30 = vpop.f32.mrb[13].mxu1 }
 0xfb9   :  { %3156 = vrcp.f32 %v1110_v22 }
 0xfc3   :  { %v3157_v33 = vpop.eup %3156 }
 0xfc4   :  { %2643 = vmatmul.mubr.f32.vlgmr.msra.gmra.mrb[10].mxu0 %v3157_v33 }
 0xfc5   :  { %3018 = vmatpush3.bf16.msra.mxu0 %v3656_v26  ;;  %2698 = vmatprep.mubr.msk.f32.mxu0 %vm3247_vm0, %v3248_v11 }
 0xfc6   :  { %3019 = vmatprep.subr.bf16.mxu0 %v3246_v3 }
 0xfc9   :  { %3021 = vmatpush3.bf16.msra.mxu0 %v3662_v28 }
 0xfca   :  { %3046 = vmatprep.subr.bf16.mxu0 %v3246_v3 }
0x1097   :  { %v1179_v35 = vpop.f32.mrb[10].mxu0 }
0x1098   :  { %v1183_v36 = vsub.f32 %v3532_v6, %v1179_v35  ;;  %v2644_v38 = vpop.f32.mrb[11].mxu0 }
0x109a   :  { %v1262_v40 = vadd.f32 %v1258_v23, %v1183_v36 }
0x109c   :  { %3158 = vtanh.f32 %v1262_v40  ;;  %v2170_v44 = vmul.f32 -1.442695, %v1262_v40 }
0x109e   :  { %3160 = vpow2.f32 %v2170_v44 }
0x10a6   :  { %v3159_v41 = vpop.eup %3158 }
0x10a7   :  { %1272 = vrot.lane.b32.xlu1 %v3159_v41, %s3250_s22 }
0x10a8   :  { %v3161_v47 = vpop.eup %3160 }
0x10a9   :  { %v1266_v50 = vadd.f32 1.0, %v3161_v47 }
0x10ab   :  { %3162 = vrcp.f32 %v1266_v50 }
0x10b5   :  { %v3163_v51 = vpop.eup %3162 }
0x10b6   :  { %v1270_v56 = vmul.f32 %v3163_v51, %v3709_v16 }
0x1119   :  { %v1273_v52 = vpop.permute.xlu1 %1272 }
0x111a   :  { %v1275_v54 = vmul.f32 %v3163_v51, %v1273_v52 }
0x111c   :  { %1277 = vrot.lane.b32.xlu0 %v1275_v54, %s3251_s5 }
0x118e   :  { %v1278_v59 = vpop.permute.xlu0 %1277 }
0x118f   :  { %v3798_v61 = vadd.f32 %v1278_v59, %v1270_v56 }
0x1191   :  { %3164 = vtanh.f32 %v3798_v61 }
0x119b   :  { %v3165_v62 = vpop.eup %3164 }
0x119c   :  { %1283 = vrot.lane.b32.xlu1 %v3165_v62, %s3250_s22 }
0x11a0   :  { %1367 = vrot.lane.b32.xlu1 %v2172_v0, %s3252_s16 }
0x11a4   :  { %1376 = vrot.lane.b32.xlu1 %v1019_v10, %s3254_s4 }
0x120e   :  { %v1284_v2 = vpop.permute.xlu1 %1283 }
0x120f   :  { %v1286_v4 = vmul.f32 %v3163_v51, %v1284_v2 }
0x1211   :  { %1288 = vrot.lane.b32.xlu0 %v1286_v4, %s3251_s5 }
0x1212   :  { %v1368_v14 = vpop.permute.xlu1 %1367 }
0x1216   :  { %v1377_v21 = vpop.permute.xlu1 %1376 }
0x1283   :  { %v1289_v16 = vpop.permute.xlu0 %1288 }
0x1284   :  { %2673 = vmatmul.mubr.msk.f32.vlgmr.msra.gmra.mrb[14].mxu1 %vm365_vm1, %v1289_v16 }
0x1285   :  { %3009 = vmatpush3.bf16.msra.mxu1 %v3581_v42  ;;  %2687 = vmatprep.mubr.msk.f32.mxu1 %vm3247_vm0, %v3248_v11 }
0x1286   :  { %3010 = vmatprep.subr.bf16.mxu1 %v3246_v3 }
0x1289   :  { %3012 = vmatpush3.bf16.msra.mxu1 %v3587_v45 }
0x128a   :  { %3013 = vmatprep.subr.bf16.mxu1 %v3246_v3 }
0x128d   :  { %3015 = vmatpush3.bf16.msra.mxu1 %v3607_v55 }
0x128e   :  { %3022 = vmatprep.subr.bf16.mxu1 %v3246_v3 }
0x1357   :  { %v1358_v7 = vpop.f32.mrb[14].mxu1 }
0x1358   :  { %v3818_v9 = vadd.f32 %v3595_v46, %v1358_v7  ;;  %v2674_v10 = vpop.f32.mrb[15].mxu1 }
0x135a   :  { %v1362_v12 = vmul.f32 1.442695, %v3818_v9 }
0x135c   :  { %3166 = vpow2.f32 %v1362_v12 }
0x1366   :  { %v3821_v20 = vpop.eup %3166 }
0x1367   :  { %v1370_v15 = vmul.f32 %v3821_v20, %v1368_v14  ;;  %v2181_v14 = vld [vmem:[%s4026_s1 + $0x18] sm:$0xff] }
0x1369   :  { %1372 = vrot.lane.b32.xlu0 %v1370_v15, %s3253_s9 }
0x13db   :  { %v1373_v17 = vpop.permute.xlu0 %1372 }
0x13dc   :  { %v1375_v18 = vadd.f32 %v1373_v17, %v3818_v9 }
0x13de   :  { %v1379_v24 = vsel %vm451_vm2, %v1375_v18, %v1377_v21 }
0x13df   :  { %2688 = vmatmul.mubr.msk.f32.vlgmr.msra.gmra.mrb[16].mxu1 %vm459_vm3, %v1379_v24 }
0x13e0   :  { %3024 = vmatpush3.bf16.msra.mxu1 %v3357_v8  ;;  %2733 = vmatprep.mubr.msk.f32.mxu1 %vm3247_vm0, %v3248_v11 }
0x13e1   :  { %3025 = vmatprep.subr.bf16.mxu1 %v3246_v3 }
0x13e4   :  { %3027 = vmatpush3.bf16.msra.mxu1 %v3371_v13 }
0x13e5   :  { %3028 = vmatprep.subr.bf16.mxu1 %v3246_v3 }
0x13e8   :  { %3030 = vmatpush3.bf16.msra.mxu1 %v3388_v19 }
0x13e9   :  { %3031 = vmatprep.subr.bf16.mxu1 %v3246_v3 }
0x13ec   :  { %3033 = vmatpush3.bf16.msra.mxu1 %v3405_v25 }
0x13ed   :  { %3034 = vmatprep.subr.bf16.mxu1 %v3246_v3 }
0x13f0   :  { %3036 = vmatpush3.bf16.msra.mxu1 %v3422_v31 }
0x13f1   :  { %3037 = vmatprep.subr.bf16.mxu1 %v3246_v3 }
0x13f4   :  { %3039 = vmatpush3.bf16.msra.mxu1 %v3439_v37 }
0x13f5   :  { %3040 = vmatprep.subr.bf16.mxu1 %v3246_v3 }
0x13f8   :  { %3042 = vmatpush3.bf16.msra.mxu1 %v3456_v43 }
0x13f9   :  { %3043 = vmatprep.subr.bf16.mxu1 %v3246_v3 }
0x13fc   :  { %3045 = vmatpush3.bf16.msra.mxu1 %v3473_v49 }
0x13fd   :  { %3073 = vmatprep.subr.bf16.mxu1 %v3246_v3 }
0x14b2   :  { %v1449_v8 = vpop.f32.mrb[16].mxu1 }
0x14b3   :  { %v1450_v13 = vadd.f32 %v3639_v1, %v1449_v8  ;;  %v2689_v19 = vpop.f32.mrb[17].mxu1 }
0x14b5   :  { %3168 = vtanh.f32 %v1450_v13  ;;  %v2174_v31 = vmul.f32 -1.442695, %v1450_v13 }
0x14b7   :  { %3170 = vpow2.f32 %v2174_v31 }
0x14bf   :  { %v3169_v25 = vpop.eup %3168 }
0x14c0   :  { %1462 = vrot.lane.b32.xlu0 %v3169_v25, %s3250_s22 }
0x14c1   :  { %v3171_v37 = vpop.eup %3170 }
0x14c2   :  { %v1456_v22 = vadd.f32 1.0, %v3171_v37 }
0x14c4   :  { %3172 = vrcp.f32 %v1456_v22 }
0x14ce   :  { %v3173_v43 = vpop.eup %3172 }
0x14cf   :  { %v1460_v49 = vmul.f32 %v3173_v43, %v3762_v5 }
0x1532   :  { %v1463_v23 = vpop.permute.xlu0 %1462 }
0x1533   :  { %v1465_v30 = vmul.f32 %v3173_v43, %v1463_v23 }
0x1535   :  { %1467 = vrot.lane.b32.xlu1 %v1465_v30, %s3251_s5 }
0x15a7   :  { %v1468_v33 = vpop.permute.xlu1 %1467 }
0x15a8   :  { %v3850_v35 = vadd.f32 %v1468_v33, %v1460_v49 }
0x15aa   :  { %3174 = vtanh.f32 %v3850_v35 }
0x15b4   :  { %v3175_v36 = vpop.eup %3174 }
0x15b5   :  { %1473 = vrot.lane.b32.xlu0 %v3175_v36, %s3250_s22 }
0x15b9   :  { %1642 = vrot.lane.b32.xlu0 %v1286_v4, %s3250_s22 }
0x1627   :  { %v1474_v38 = vpop.permute.xlu0 %1473 }
0x1628   :  { %v1476_v40 = vmul.f32 %v3173_v43, %v1474_v38 }
0x162a   :  { %1478 = vrot.lane.b32.xlu1 %v1476_v40, %s3251_s5 }
0x162b   :  { %v1643_v5 = vpop.permute.xlu0 %1642 }
0x169c   :  { %v1479_v41 = vpop.permute.xlu1 %1478 }
0x169d   :  { %2699 = vmatmul.mubr.msk.f32.vlgmr.msra.gmra.mrb[12].mxu0 %vm365_vm1, %v1479_v41 }
0x169e   :  { %3048 = vmatpush3.bf16.msra.mxu0 %v3486_v53  ;;  %2752 = vmatprep.mubr.msk.f32.mxu0 %vm3247_vm0, %v3248_v11  ;;  %v1645_v53 = vsel %vm365_vm1, %v1479_v41, %v1643_v5  ;;  %v640_v5 = vmul.f32 %v3598_v48, %v3598_v48 }
0x169f   :  { %3049 = vmatprep.subr.bf16.mxu0 %v3246_v3 }
0x16a2   :  { %3051 = vmatpush3.bf16.msra.mxu0 %v3499_v57 }
0x16a3   :  { %3052 = vmatprep.subr.bf16.mxu0 %v3246_v3 }
0x16a6   :  { %3054 = vmatpush3.bf16.msra.mxu0 %v3511_v60 }
0x16a7   :  { %3055 = vmatprep.subr.bf16.mxu0 %v3246_v3 }
0x16aa   :  { %3057 = vmatpush3.bf16.msra.mxu0 %v3521_v63 }
0x16ab   :  { %3058 = vmatprep.subr.bf16.mxu0 %v3246_v3 }
0x16ad   :  { %2753 = vmatmul.mubr.msk.f32.vlgmr.msra.gmra.mrb[14].mxu0 %vm257_vm4, %v1645_v53  ;;  %v1554_v53 = vmul.f32 %v3818_v9, %v3818_v9 }
0x16ae   :  { %3060 = vmatpush3.bf16.msra.mxu0 %v3549_v29  ;;  %2763 = vmatprep.mubr.msk.f32.mxu0 %vm3247_vm0, %v3248_v11 }
0x16af   :  { %3061 = vmatprep.subr.bf16.mxu0 %v3246_v3 }
0x16b2   :  { %3063 = vmatpush3.bf16.msra.mxu0 %v3555_v32 }
0x16b3   :  { %3064 = vmatprep.subr.bf16.mxu0 %v3246_v3 }
0x1770   :  { %v1548_v57 = vpop.f32.mrb[12].mxu0 }
0x1771   :  { %v1549_v60 = vadd.f32 %v3696_v39, %v1548_v57  ;;  %v2700_v63 = vpop.f32.mrb[13].mxu0 }
0x1773   :  { %v2177_v44 = vmul.f32 -1.442695, %v1549_v60 }
0x1775   :  { %3176 = vpow2.f32 %v2177_v44 }
0x177f   :  { %v3177_v47 = vpop.eup %3176 }
0x1780   :  { %v1567_v50 = vadd.f32 1.0, %v3177_v47  ;;  %v1715_v51 = vpop.f32.mrb[14].mxu0  ;;  %v639_v47 = vmul.f32 %v3611_v58, %v3611_v58  ;;  %v1095_v58 = vsub.f32 0.0, %v3730_v27 }
0x1781   :  { %v2754_v52 = vpop.f32.mrb[15].mxu0 }
0x1782   :  { %3178 = vrcp.f32 %v1567_v50  ;;  %v1553_v52 = vmul.f32 %v3821_v20, %v3821_v20 }
0x178c   :  { %v3179_v29 = vpop.eup %3178 }
0x178d   :  { %2734 = vmatmul.mubr.f32.vlgmr.msra.gmra.mrb[18].mxu1 %v3179_v29 }
0x178e   :  { %3075 = vmatpush3.bf16.msra.mxu1 %v3656_v26  ;;  %2789 = vmatprep.mubr.msk.f32.mxu1 %vm3247_vm0, %v3248_v11 }
0x178f   :  { %3076 = vmatprep.subr.bf16.mxu1 %v3246_v3 }
0x1792   :  { %3078 = vmatpush3.bf16.msra.mxu1 %v3662_v28 }
0x1860   :  { %v1636_v32 = vpop.f32.mrb[18].mxu1 }
0x1861   :  { %v1640_v54 = vsub.f32 %v3532_v6, %v1636_v32  ;;  %v2735_v56 = vpop.f32.mrb[19].mxu1 }
0x1862   :  { %v1096_v56 = vmul.f32 %v3733_v34, %v3733_v34  ;;  %v2022_v34 = vld [vmem:[%s4037_s12 + $0x8] sm:$0xff] }
0x1863   :  { %v1719_v59 = vadd.f32 %v1715_v51, %v1640_v54 }
0x1865   :  { %3180 = vtanh.f32 %v1719_v59  ;;  %v2179_v0 = vmul.f32 -1.442695, %v1719_v59 }
0x1867   :  { %3182 = vpow2.f32 %v2179_v0 }
0x186f   :  { %v3181_v62 = vpop.eup %3180 }
0x1870   :  { %1729 = vrot.lane.b32.xlu1 %v3181_v62, %s3250_s22  ;;  %v638_v62 = vsub.f32 0.0, %v3598_v48  ;;  %v2023_v48 = vld [vmem:[%s4037_s12 + $0x10] sm:$0xff] }
0x1871   :  { %v3183_v2 = vpop.eup %3182 }
0x1872   :  { %v1723_v26 = vadd.f32 1.0, %v3183_v2 }
0x1874   :  { %3184 = vrcp.f32 %v1723_v26 }
0x187e   :  { %v3185_v4 = vpop.eup %3184 }
0x187f   :  { %v1727_v28 = vmul.f32 %v3185_v4, %v3798_v61 }
0x18e2   :  { %v1730_v16 = vpop.permute.xlu1 %1729 }
0x18e3   :  { %v1732_v7 = vmul.f32 %v3185_v4, %v1730_v16 }
0x18e5   :  { %1734 = vrot.lane.b32.xlu0 %v1732_v7, %s3251_s5  ;;  %v2021_v7 = vld [vmem:[%s4037_s12] sm:$0xff] }
0x1957   :  { %v1735_v10 = vpop.permute.xlu0 %1734 }
0x1958   :  { %v1737_v6 = vadd.f32 %v1735_v10, %v1727_v28  ;;  %v3080_v10 = vpack.c.bf16 %v2022_v34, %v2021_v7 }
0x195a   :  { %3186 = vtanh.f32 %v1737_v6 }
0x1964   :  { %v3187_v12 = vpop.eup %3186 }
0x1965   :  { %1740 = vrot.lane.b32.xlu1 %v3187_v12, %s3250_s22 }
0x1969   :  { %1824 = vrot.lane.b32.xlu1 %v2181_v14, %s3252_s16 }
0x196d   :  { %1833 = vrot.lane.b32.xlu1 %v1476_v40, %s3254_s4 }
0x19d7   :  { %v1741_v15 = vpop.permute.xlu1 %1740 }
0x19d8   :  { %v1743_v17 = vmul.f32 %v3185_v4, %v1741_v15  ;;  %v1552_v4 = vsub.f32 0.0, %v3818_v9 }
0x19da   :  { %1745 = vrot.lane.b32.xlu0 %v1743_v17, %s3251_s5 }
0x19db   :  { %v1825_v13 = vpop.permute.xlu1 %1824 }
0x19df   :  { %v1834_v31 = vpop.permute.xlu1 %1833 }
0x1a4c   :  { %v1746_v18 = vpop.permute.xlu0 %1745 }
0x1a4d   :  { %2764 = vmatmul.mubr.msk.f32.vlgmr.msra.gmra.mrb[16].mxu0 %vm365_vm1, %v1746_v18 }
0x1a4e   :  { %3066 = vmatpush3.bf16.msra.mxu0 %v3581_v42  ;;  %2778 = vmatprep.mubr.msk.f32.mxu0 %vm3247_vm0, %v3248_v11 }
0x1a4f   :  { %3067 = vmatprep.subr.bf16.mxu0 %v3246_v3 }
0x1a52   :  { %3069 = vmatpush3.bf16.msra.mxu0 %v3587_v45 }
0x1a53   :  { %3070 = vmatprep.subr.bf16.mxu0 %v3246_v3 }
0x1a56   :  { %3072 = vmatpush3.bf16.msra.mxu0 %v3607_v55 }
0x1a57   :  { %3079 = vmatprep.subr.bf16.mxu0 %v3246_v3 }
0x1b20   :  { %v1815_v61 = vpop.f32.mrb[16].mxu0 }
0x1b21   :  { %v3902_v21 = vadd.f32 %v3595_v46, %v1815_v61  ;;  %v2765_v24 = vpop.f32.mrb[17].mxu0 }
0x1b22   :  { %v2025_v24 = vld [vmem:[%s4037_s12 + $0x20] sm:$0xff] }
0x1b23   :  { %v1819_v42 = vmul.f32 1.442695, %v3902_v21  ;;  %v2011_v63 = vmul.f32 %v3902_v21, %v3902_v21  ;;  %v2009_v18 = vsub.f32 0.0, %v3902_v21 }
0x1b25   :  { %3188 = vpow2.f32 %v1819_v42  ;;  %v2026_v42 = vld [vmem:[%s4037_s12 + $0x28] sm:$0xff] }
0x1b2f   :  { %v3189_v8 = vpop.eup %3188 }
0x1b30   :  { %v1827_v19 = vmul.f32 %v3189_v8, %v1825_v13  ;;  %v2010_v20 = vmul.f32 %v3189_v8, %v3189_v8 }
0x1b32   :  { %1829 = vrot.lane.b32.xlu0 %v1827_v19, %s3253_s9 }
0x1ba4   :  { %v1830_v45 = vpop.permute.xlu0 %1829 }
0x1ba5   :  { %v1832_v25 = vadd.f32 %v1830_v45, %v3902_v21  ;;  %v3086_v45 = vpack.c.bf16 %v2026_v42, %v2025_v24  ;;  %v2027_v21 = vld [vmem:[%s4037_s12 + $0x30] sm:$0xff] }
0x1ba7   :  { %v1836_v55 = vsel %vm451_vm2, %v1832_v25, %v1834_v31 }
0x1ba8   :  { %2779 = vmatmul.mubr.msk.f32.vlgmr.msra.gmra.mrb[18].mxu0 %vm459_vm3, %v1836_v55  ;;  %v2028_v55 = vld [vmem:[%s4037_s12 + $0x38] sm:$0xff] }
0x1ba9   :  { %2824 = vmatprep.mubr.msk.f32.mxu0 %vm3247_vm0, %v3248_v11  ;;  %3081 = vmatpush3.bf16.msra.mxu0 %v3080_v10 }
0x1baa   :  { %3082 = vmatprep.subr.bf16.mxu0 %v3246_v3 }
0x1c7b   :  { %v1906_v46 = vpop.f32.mrb[18].mxu0 }
0x1c7c   :  { %v1907_v37 = vadd.f32 %v3639_v1, %v1906_v46  ;;  %v2780_v22 = vpop.f32.mrb[19].mxu0 }
0x1c7d   :  { %v2029_v22 = vld [vmem:[%s4037_s12 + $0x40] sm:$0xff] }
0x1c7e   :  { %3190 = vtanh.f32 %v1907_v37  ;;  %v2183_v23 = vmul.f32 -1.442695, %v1907_v37  ;;  %v3089_v37 = vpack.c.bf16 %v2028_v55, %v2027_v21 }
0x1c80   :  { %3192 = vpow2.f32 %v2183_v23 }
0x1c88   :  { %v3191_v43 = vpop.eup %3190 }
0x1c89   :  { %1919 = vrot.lane.b32.xlu0 %v3191_v43, %s3250_s22  ;;  %v2030_v43 = vld [vmem:[%s4037_s12 + $0x48] sm:$0xff] }
0x1c8a   :  { %v3193_v30 = vpop.eup %3192  ;;  %v3092_v23 = vpack.c.bf16 %v2030_v43, %v2029_v22 }
0x1c8b   :  { %v1913_v49 = vadd.f32 1.0, %v3193_v30  ;;  %v2031_v30 = vld [vmem:[%s4037_s12 + $0x50] sm:$0xff] }
0x1c8d   :  { %3194 = vrcp.f32 %v1913_v49  ;;  %v2032_v49 = vld [vmem:[%s4037_s12 + $0x58] sm:$0xff] }
0x1c97   :  { %v3195_v33 = vpop.eup %3194 }
0x1c98   :  { %v1917_v11 = vmul.f32 %v3195_v33, %v3850_v35  ;;  %v1097_v35 = vmul.f32 %v3730_v27, %v3730_v27  ;;  %v2024_v27 = vld [vmem:[%s4037_s12 + $0x18] sm:$0xff] }
0x1c99   :  { %v3083_v14 = vpack.c.bf16 %v2024_v27, %v2023_v48 }
0x1c9b   :  { %3084 = vmatpush3.bf16.msra.mxu0 %v3083_v14 }
0x1c9c   :  { %3085 = vmatprep.subr.bf16.mxu0 %v3246_v3 }
0x1c9f   :  { %3087 = vmatpush3.bf16.msra.mxu0 %v3086_v45 }
0x1ca0   :  { %3088 = vmatprep.subr.bf16.mxu0 %v3246_v3 }
0x1ca3   :  { %3090 = vmatpush3.bf16.msra.mxu0 %v3089_v37 }
0x1ca4   :  { %3091 = vmatprep.subr.bf16.mxu0 %v3246_v3 }
0x1ca7   :  { %3093 = vmatpush3.bf16.msra.mxu0 %v3092_v23 }
0x1ca8   :  { %3094 = vmatprep.subr.bf16.mxu0 %v3246_v3 }
0x1cfb   :  { %v1920_v36 = vpop.permute.xlu0 %1919 }
0x1cfc   :  { %v1922_v38 = vmul.f32 %v3195_v33, %v1920_v36  ;;  %v2033_v36 = vld [vmem:[%s4037_s12 + $0x60] sm:$0xff] }
0x1cfe   :  { %1924 = vrot.lane.b32.xlu1 %v1922_v38, %s3251_s5  ;;  %v2034_v38 = vld [vmem:[%s4037_s12 + $0x68] sm:$0xff] }
0x1d70   :  { %v1925_v40 = vpop.permute.xlu1 %1924 }
0x1d71   :  { %v1927_v41 = vadd.f32 %v1925_v40, %v1917_v11  ;;  %v3098_v11 = vpack.c.bf16 %v2034_v38, %v2033_v36  ;;  %v2035_v40 = vld [vmem:[%s4037_s12 + $0x70] sm:$0xff] }
0x1d73   :  { %3196 = vtanh.f32 %v1927_v41  ;;  %v2036_v41 = vld [vmem:[%s4037_s12 + $0x78] sm:$0xff] }
0x1d7d   :  { %v3197_v1 = vpop.eup %3196 }
0x1d7e   :  { %1930 = vrot.lane.b32.xlu0 %v3197_v1, %s3250_s22  ;;  %v3101_v1 = vpack.c.bf16 %v2036_v41, %v2035_v40 }
0x1d82   :  { %642 = vrot.lane.b32.xlu0 %v640_v5, %s3252_s16 }
0x1d86   :  { %1556 = vrot.lane.b32.xlu0 %v1554_v53, %s3252_s16 }
0x1df0   :  { %v1931_v57 = vpop.permute.xlu0 %1930 }
0x1df1   :  { %v1933_v60 = vmul.f32 %v3195_v33, %v1931_v57  ;;  %v3095_v33 = vpack.c.bf16 %v2032_v49, %v2031_v30 }
0x1df3   :  { %1935 = vrot.lane.b32.xlu1 %v1933_v60, %s3251_s5  ;;  %3096 = vmatpush3.bf16.msra.mxu0 %v3095_v33 }
0x1df4   :  { %v643_v44 = vpop.permute.xlu0 %642  ;;  %3097 = vmatprep.subr.bf16.mxu0 %v3246_v3 }
0x1df5   :  { %v645_v51 = vadd.f32 %v643_v44, %v639_v47 }
0x1df7   :  { %1099 = vrot.lane.b32.xlu1 %v1097_v35, %s3252_s16  ;;  %v646_v54 = vmul.f32 0.5, %v645_v51  ;;  %3099 = vmatpush3.bf16.msra.mxu0 %v3098_v11 }
0x1df8   :  { %v1557_v50 = vpop.permute.xlu0 %1556  ;;  %3100 = vmatprep.subr.bf16.mxu0 %v3246_v3 }
0x1df9   :  { %v1559_v32 = vadd.f32 %v1557_v50, %v1553_v52  ;;  %v647_v26 = vadd.f32 %v646_v54, %v638_v62 }
0x1dfb   :  { %2013 = vrot.lane.b32.xlu1 %v2011_v63, %s3252_s16  ;;  %v1560_v0 = vmul.f32 0.5, %v1559_v32  ;;  %v2158_v15 = vadd.f32 -0.5, %v647_v26  ;;  %3102 = vmatpush3.bf16.msra.mxu0 %v3101_v1 }
0x1dfd   :  { %v1561_v9 = vadd.f32 %v1560_v0, %v1552_v4 }
0x1dff   :  { %v2176_v8 = vadd.f32 -0.5, %v1561_v9 }
0x1e65   :  { %v1936_v29 = vpop.permute.xlu1 %1935 }
0x1e66   :  { %2790 = vmatmul.mubr.msk.f32.vlgmr.msra.gmra.mrb[20].mxu1 %vm365_vm1, %v1936_v29 }
0x1e69   :  { %v1100_v59 = vpop.permute.xlu1 %1099 }
0x1e6a   :  { %v1102_v2 = vadd.f32 %v1100_v59, %v1096_v56 }
0x1e6c   :  { %v1103_v16 = vmul.f32 0.5, %v1102_v2 }
0x1e6d   :  { %v2014_v28 = vpop.permute.xlu1 %2013 }
0x1e6e   :  { %v1104_v6 = vadd.f32 %v1103_v16, %v1095_v58  ;;  %v2016_v12 = vadd.f32 %v2014_v28, %v2010_v20 }
0x1e70   :  { %v2167_v17 = vadd.f32 -0.5, %v1104_v6  ;;  %v2017_v61 = vmul.f32 0.5, %v2016_v12 }
0x1e72   :  { %v1106_v13 = vadd.f32 %v2167_v17, %v2158_v15  ;;  %v2018_v19 = vadd.f32 %v2017_v61, %v2009_v18 }
0x1e74   :  { %v2185_v25 = vadd.f32 -0.5, %v2018_v19  ;;  %v1563_v31 = vadd.f32 %v2176_v8, %v1106_v13 }
0x1e76   :  { %v2020_v46 = vadd.f32 %v2185_v25, %v1563_v31 }
0x1e78   :  { %2116 = vrot.lane.b32.xlu0 %v2020_v46, %s3253_s9 }
0x1eea   :  { %v2117_v5 = vpop.permute.xlu0 %2116 }
0x1eeb   :  { %v2119_v53 = vsel %vm451_vm2, %v2117_v5, 0.0 }
0x1eec   :  { %2120 = vst [vmem:[#allocation4] sm:$0xff] %v2119_v53 }
0x1f39   :  { %v2005_v57 = vpop.f32.mrb[20].mxu1 }
0x1f3a   :  { %v2006_v60 = vadd.f32 %v3696_v39, %v2005_v57  ;;  %v2791_v35 = vpop.f32.mrb[21].mxu1 }
0x1f3c   :  { %2825 = vmatmul.mubr.f32.vlgmr.msra.gmra.mrb[20].mxu0 %v2006_v60 }
0x1f3d   :  { %3209 = shalt.err (!%p3206_p4)
}
0x1f3e   :  { %s3210_s7 = scalar_lea.hbm %s4040_s15, 128 }
0x1f3f   :  { %p3211_p5 = scmp.ne.s32.totalorder %s4040_s15, %s3210_s7  ;;  %p3214_p6 = scmp.lt.u32.totalorder %s3210_s7, %s4040_s15 }
0x1f41   :  { %p3216_p7 = pnand %p3214_p6, %p3211_p5 }
0x1f43   :  { %3219 = shalt.err (!%p3216_p7)
}
0x1f44   :  { %2140 = dma.vmem_to_hbm [thread:$0]  %s2138_s27, 128, %s4040_s15, [#allocation5]   ;;  %v2186_v3 = vld [vmem:[%s4038_s13] ss:$0 sm:$0xff] }
0x1f45   :  { %s3256_s20 = smov [#allocation2]  }
0x1f46   :  { %s2127_s11 = sshll.u32 %s3256_s20, 4  ;;  %s2128_s11 = int_to_ptr.vmem [resolvable:$true] %s2127_s11 }
0x1f47   :  { %s3220_s21 = scalar_lea.vmem %s2128_s11, 128  ;;  %p3225_p9 = scmp.lt.s32.totalorder %s2128_s11, %s2128_s11 }
0x1f48   :  { %p3221_p8 = scmp.ne.s32.totalorder %s2128_s11, %s3220_s21  ;;  %p3226_p10 = scmp.lt.s32.totalorder %s3220_s21, %s3220_s21 }
0x1f4a   :  { %p3227_p11 = por %p3226_p10, %p3225_p9 }
0x1f4c   :  { %p3228_p12 = pnand %p3227_p11, %p3221_p8 }
0x200f   :  { %v2110_v39 = vpop.f32.mrb[20].mxu0 }
0x2010   :  { %v2111_v63 = vadd.f32 %v2186_v3, %v2110_v39  ;;  %v2826_v44 = vpop.f32.mrb[21].mxu0 }
0x2012   :  { %2114 = vst [vmem:[#allocation2] sm:$0xff] %v2111_v63 }
0x2013   :  { %3231 = shalt.err (!%p3228_p12)
}
0x2014   :  { %s3232_s2 = scalar_lea.hbm %s4039_s14, 128 }
0x2015   :  { %p3233_p13 = scmp.ne.s32.totalorder %s4039_s14, %s3232_s2  ;;  %p3236_p0 = scmp.lt.u32.totalorder %s3232_s2, %s4039_s14 }
0x2017   :  { %p3238_p1 = pnand %p3236_p0, %p3233_p13 }
0x2019   :  { %3241 = shalt.err (!%p3238_p1)
}
0x201a   :  { %2130 = dma.vmem_to_hbm [thread:$0]  %s2128_s11, 128, %s4039_s14, [#allocation3]  }
0x201b   :  { %3242 = dma.done.wait [#allocation3], 128  }
0x201c   :  { %3243 = vsyncadd [#allocation3], 4294967168 }
0x201d   :  { %3244 = dma.done.wait [#allocation5], 128  }
0x201e   :  { %3245 = vsyncadd [#allocation5], 4294967168 }
0x201f   :  { %2147 = vsyncpa [#allocation3], 1 }
0x2020   :  { %2148 = vsyncpa [#allocation5], 1 }

</bundles_post_ra>
